<compile_context>
chip_gen: v7x
topology: tpu7x:2x2x1
jax: 0.10.0
libtpu: 0.0.40
codegen_flags: <defaults>
</compile_context>

<pallas_src>
import functools

import jax
import jax.numpy as jnp
from jax.experimental import pallas as pl
from jax.experimental.pallas import tpu as pltpu

IN_F, HID, OUT_F = 55, 100, 5


def mlp_stats_kernel(x_ref, w1_ref, b1_ref, w2_ref, b2_ref, w3_ref, b3_ref,
                     h3_ref, m_ref, l_ref, *, tb, b_valid):
    """One batch tile: h3 = relu(W3 @ relu(W2 @ relu(W1 @ x^T + b1) + b2) + b3)
    plus per-tile softmax partials (running max / exp-sum over the batch lanes).

    x arrives in its natural (tb, 55) f32 layout; the first matmul contracts
    dim 1 of both operands (transposed-RHS), yielding the lane-dense
    (features, batch) layout used for the rest of the network.
    """
    i = pl.program_id(0)

    x = x_ref[...].astype(jnp.bfloat16)                               # (tb, 55)
    # Layer 1: (HID, IN_F) x (tb, IN_F) contracted on IN_F -> (HID, tb), MXU.
    h1 = jax.lax.dot_general(w1_ref[...], x, (((1,), (1,)), ((), ())),
                             preferred_element_type=jnp.float32)
    h1 = jnp.maximum(h1 + b1_ref[...], 0.0).astype(jnp.bfloat16)      # (100, tb)
    h2 = jnp.dot(w2_ref[...], h1, preferred_element_type=jnp.float32)
    h2 = jnp.maximum(h2 + b2_ref[...], 0.0).astype(jnp.bfloat16)      # (100, tb)
    h3 = jnp.dot(w3_ref[...], h2, preferred_element_type=jnp.float32)
    h3 = jnp.maximum(h3 + b3_ref[...], 0.0)                           # (5, tb) f32

    # Mask lanes beyond the true batch size (last tile may be partial): write
    # clean zeros into padded h3 columns and exclude them from the stats.
    lane = jax.lax.broadcasted_iota(jnp.int32, (OUT_F, tb), 1) + i * tb
    valid = lane < b_valid
    h3 = jnp.where(valid, h3, 0.0)
    h3_ref[...] = h3

    m_i = jnp.max(jnp.where(valid, h3, -jnp.inf), axis=1, keepdims=True)   # (5,1)
    l_i = jnp.sum(jnp.where(valid, jnp.exp(h3 - m_i), 0.0),
                  axis=1, keepdims=True)                                    # (5,1)
    m_ref[...] = m_i.reshape(1, OUT_F, 1)
    l_ref[...] = l_i.reshape(1, OUT_F, 1)


def softmax_norm_kernel(h3_ref, m_ref, invl_ref, o_ref):
    """Normalize one lane-dense (5, tb) logits tile with global (m, 1/l)."""
    o_ref[...] = jnp.exp(h3_ref[...] - m_ref[...]) * invl_ref[...]


def _cdiv(a, b):
    return -(-a // b)


def _round_up(a, b):
    return _cdiv(a, b) * b


@functools.partial(jax.jit, static_argnames=("tb",))
def ffnet_forward(x, w1, b1, w2, b2, w3, b3, *, tb=None):
    """x: (B, 55) f32; w_i PyTorch-style (out, in); b_i: (out,). Returns (B, 5) f32."""
    B = x.shape[0]
    if tb is None:
        # Big enough to amortize per-step overhead; nb >= 2 when B allows it so
        # the "parallel" axis splits across v7x's two TensorCores.
        tb = max(256, min(2048, _round_up(_cdiv(B, 2), 256)))
    nb = _cdiv(B, tb)
    b_pad = nb * tb

    # Tiny glue folded by XLA: bf16 weight copies (~31 KB total) and (out, 1)
    # f32 bias columns.  x itself is consumed untouched (no transpose / pad).
    w1b, w2b, w3b = (w.astype(jnp.bfloat16) for w in (w1, w2, w3))
    b1c, b2c, b3c = b1[:, None], b2[:, None], b3[:, None]

    resident = lambda shape: pl.BlockSpec(shape, lambda i: (0, 0))
    lane_tile = lambda rows: pl.BlockSpec((rows, tb), lambda i: (0, i))
    stat_spec = pl.BlockSpec((1, OUT_F, 1), lambda i: (i, 0, 0))

    # Pass 1 (heavy, fully parallel): streamed x tiles, resident weights,
    # lane-dense h3 tiles + per-tile softmax partials.
    h3, m_parts, l_parts = pl.pallas_call(
        functools.partial(mlp_stats_kernel, tb=tb, b_valid=B),
        out_shape=(
            jax.ShapeDtypeStruct((OUT_F, b_pad), jnp.float32),
            jax.ShapeDtypeStruct((nb, OUT_F, 1), jnp.float32),
            jax.ShapeDtypeStruct((nb, OUT_F, 1), jnp.float32),
        ),
        grid=(nb,),
        in_specs=[
            pl.BlockSpec((tb, IN_F), lambda i: (i, 0)),        # x, natural layout
            resident((HID, IN_F)), resident((HID, 1)),
            resident((HID, HID)), resident((HID, 1)),
            resident((OUT_F, HID)), resident((OUT_F, 1)),
        ],
        out_specs=(lane_tile(OUT_F), stat_spec, stat_spec),
        compiler_params=pltpu.CompilerParams(
            dimension_semantics=("parallel",),
            vmem_limit_bytes=32 * 1024 * 1024,
        ),
    )(x, w1b, b1c, w2b, b2c, w3b, b3c)

    # Combine the nb per-tile partials (tiny log-sum-exp, plain JAX).  1/l is
    # computed exactly here on 5 values, so the kernel only multiplies.
    mp = m_parts[:, :, 0]                                   # (nb, 5)
    lp = l_parts[:, :, 0]                                   # (nb, 5)
    m = jnp.max(mp, axis=0, keepdims=True)                  # (1, 5)
    l = jnp.sum(lp * jnp.exp(mp - m), axis=0)               # (5,)
    m_col = m.reshape(OUT_F, 1)
    inv_l = (1.0 / l).reshape(OUT_F, 1)

    # Pass 2 (tiny, parallel): lane-dense normalization.
    oT = pl.pallas_call(
        softmax_norm_kernel,
        out_shape=jax.ShapeDtypeStruct((OUT_F, b_pad), jnp.float32),
        grid=(nb,),
        in_specs=[lane_tile(OUT_F), resident((OUT_F, 1)), resident((OUT_F, 1))],
        out_specs=lane_tile(OUT_F),
        compiler_params=pltpu.CompilerParams(
            dimension_semantics=("parallel",),
        ),
    )(h3, m_col, inv_l)

    return oT[:, :B].T                                       # (B, 5)


def init_linear_params(key, out_features, in_features):
    """Deterministic init mimicking torch.nn.Linear default (U[-k, k], k=1/sqrt(fan_in))."""
    kw, kb = jax.random.split(key)
    bound = 1.0 / jnp.sqrt(jnp.float32(in_features))
    w = jax.random.uniform(kw, (out_features, in_features), jnp.float32, -bound, bound)
    b = jax.random.uniform(kb, (out_features,), jnp.float32, -bound, bound)
    return w, b


def reference_forward(x, w1, b1, w2, b2, w3, b3):
    h1 = jnp.maximum(x @ w1.T + b1, 0.0)
    h2 = jnp.maximum(h1 @ w2.T + b2, 0.0)
    h3 = jnp.maximum(h2 @ w3.T + b3, 0.0)
    return jax.nn.softmax(h3, axis=0)


if __name__ == "__main__":
    key = jax.random.PRNGKey(0)
    kx, k1, k2, k3 = jax.random.split(key, 4)

    # B not a multiple of the batch tile -> exercises grid (nb=2) + lane masking.
    B = 600
    x = jax.random.normal(kx, (B, IN_F), jnp.float32)
    w1, b1 = init_linear_params(k1, HID, IN_F)
    w2, b2 = init_linear_params(k2, HID, HID)
    w3, b3 = init_linear_params(k3, OUT_F, HID)

    out = jax.block_until_ready(ffnet_forward(x, w1, b1, w2, b2, w3, b3))

    ref = reference_forward(x, w1, b1, w2, b2, w3, b3)
    assert out.shape == (B, OUT_F)
    # bf16 matmul inputs (f32 accumulation) -> slightly relaxed tolerance vs f32 ref.
    assert jnp.allclose(out, ref, atol=5e-4, rtol=5e-3), "mismatch vs reference"
    # softmax over dim=0 -> each of the 5 columns sums to 1 over the batch.
    assert jnp.allclose(out.sum(axis=0), jnp.ones((OUT_F,)), atol=1e-4), "columns do not sum to 1"

    print("KERNEL_OK")
</pallas_src>

<mosaic_0001>
module attributes {stable_mosaic.version = 11 : i64} {
  func.func @mlp_stats_kernel(%arg0: i32, %arg1: memref<512x55xf32, #tpu.memory_space<vmem>>, %arg2: memref<100x55xbf16, #tpu.memory_space<vmem>>, %arg3: memref<100x1xf32, #tpu.memory_space<vmem>>, %arg4: memref<100x100xbf16, #tpu.memory_space<vmem>>, %arg5: memref<100x1xf32, #tpu.memory_space<vmem>>, %arg6: memref<5x100xbf16, #tpu.memory_space<vmem>>, %arg7: memref<5x1xf32, #tpu.memory_space<vmem>>, %arg8: memref<5x512xf32, #tpu.memory_space<vmem>>, %arg9: memref<1x5x1xf32, #tpu.memory_space<vmem>>, %arg10: memref<1x5x1xf32, #tpu.memory_space<vmem>>) attributes {dimension_semantics = [#tpu.dimension_semantics<parallel>], iteration_bounds = array<i64: 2>, scalar_prefetch = 0 : i64, scratch_operands = 0 : i64, tpu.core_type = #tpu.core_type<tc>, window_params = [{transform_indices = @transform_0, window_bounds = array<i64: 512, 55>}, {pipeline_mode = #tpu.pipeline_mode<synchronous>, transform_indices = @transform_1, window_bounds = array<i64: 100, 55>}, {pipeline_mode = #tpu.pipeline_mode<synchronous>, transform_indices = @transform_2, window_bounds = array<i64: 100, 1>}, {pipeline_mode = #tpu.pipeline_mode<synchronous>, transform_indices = @transform_3, window_bounds = array<i64: 100, 100>}, {pipeline_mode = #tpu.pipeline_mode<synchronous>, transform_indices = @transform_4, window_bounds = array<i64: 100, 1>}, {pipeline_mode = #tpu.pipeline_mode<synchronous>, transform_indices = @transform_5, window_bounds = array<i64: 5, 100>}, {pipeline_mode = #tpu.pipeline_mode<synchronous>, transform_indices = @transform_6, window_bounds = array<i64: 5, 1>}, {transform_indices = @transform_7, window_bounds = array<i64: 5, 512>}, {transform_indices = @transform_8, window_bounds = array<i64: 1, 5, 1>}, {transform_indices = @transform_9, window_bounds = array<i64: 1, 5, 1>}]} {
    %c0 = arith.constant 0 : index
    %c0_0 = arith.constant 0 : index
    %0 = vector.load %arg1[%c0, %c0_0] : memref<512x55xf32, #tpu.memory_space<vmem>>, vector<512x55xf32>
    %1 = arith.truncf %0 : vector<512x55xf32> to vector<512x55xbf16>
    %c0_1 = arith.constant 0 : index
    %c0_2 = arith.constant 0 : index
    %2 = vector.load %arg2[%c0_1, %c0_2] : memref<100x55xbf16, #tpu.memory_space<vmem>>, vector<100x55xbf16>
    %cst = arith.constant dense<0.000000e+00> : vector<100x512xf32>
    %3 = tpu.matmul %2, %1, %cst {dimension_numbers = #tpu.dot_dimension_numbers<[1], [1], [0], [0], [0, 0, 1, 0], [], []>} : vector<100x55xbf16>, vector<512x55xbf16>, vector<100x512xf32> -> vector<100x512xf32>
    %c0_3 = arith.constant 0 : index
    %c0_4 = arith.constant 0 : index
    %4 = vector.load %arg3[%c0_3, %c0_4] : memref<100x1xf32, #tpu.memory_space<vmem>>, vector<100x1xf32>
    %5 = vector.broadcast %4 : vector<100x1xf32> to vector<100x512xf32>
    %6 = arith.addf %3, %5 : vector<100x512xf32>
    %cst_5 = arith.constant 0.000000e+00 : f32
    %7 = vector.broadcast %cst_5 : f32 to vector<100x512xf32>
    %8 = arith.maximumf %6, %7 : vector<100x512xf32>
    %9 = arith.truncf %8 : vector<100x512xf32> to vector<100x512xbf16>
    %c0_6 = arith.constant 0 : index
    %c0_7 = arith.constant 0 : index
    %10 = vector.load %arg4[%c0_6, %c0_7] : memref<100x100xbf16, #tpu.memory_space<vmem>>, vector<100x100xbf16>
    %cst_8 = arith.constant dense<0.000000e+00> : vector<100x512xf32>
    %11 = tpu.matmul %10, %9, %cst_8 {dimension_numbers = #tpu.dot_dimension_numbers<[1], [0], [0], [1], [0, 0, 1, 1], [], []>} : vector<100x100xbf16>, vector<100x512xbf16>, vector<100x512xf32> -> vector<100x512xf32>
    %c0_9 = arith.constant 0 : index
    %c0_10 = arith.constant 0 : index
    %12 = vector.load %arg5[%c0_9, %c0_10] : memref<100x1xf32, #tpu.memory_space<vmem>>, vector<100x1xf32>
    %13 = vector.broadcast %12 : vector<100x1xf32> to vector<100x512xf32>
    %14 = arith.addf %11, %13 : vector<100x512xf32>
    %cst_11 = arith.constant 0.000000e+00 : f32
    %15 = vector.broadcast %cst_11 : f32 to vector<100x512xf32>
    %16 = arith.maximumf %14, %15 : vector<100x512xf32>
    %17 = arith.truncf %16 : vector<100x512xf32> to vector<100x512xbf16>
    %c0_12 = arith.constant 0 : index
    %c0_13 = arith.constant 0 : index
    %18 = vector.load %arg6[%c0_12, %c0_13] : memref<5x100xbf16, #tpu.memory_space<vmem>>, vector<5x100xbf16>
    %cst_14 = arith.constant dense<0.000000e+00> : vector<5x512xf32>
    %19 = tpu.matmul %18, %17, %cst_14 {dimension_numbers = #tpu.dot_dimension_numbers<[1], [0], [0], [1], [0, 0, 1, 1], [], []>} : vector<5x100xbf16>, vector<100x512xbf16>, vector<5x512xf32> -> vector<5x512xf32>
    %c0_15 = arith.constant 0 : index
    %c0_16 = arith.constant 0 : index
    %20 = vector.load %arg7[%c0_15, %c0_16] : memref<5x1xf32, #tpu.memory_space<vmem>>, vector<5x1xf32>
    %21 = vector.broadcast %20 : vector<5x1xf32> to vector<5x512xf32>
    %22 = arith.addf %19, %21 : vector<5x512xf32>
    %cst_17 = arith.constant 0.000000e+00 : f32
    %23 = vector.broadcast %cst_17 : f32 to vector<5x512xf32>
    %24 = arith.maximumf %22, %23 : vector<5x512xf32>
    %25 = tpu.iota {dimensions = array<i32: 1>} : vector<5x512xi32>
    %c512_i32 = arith.constant 512 : i32
    %26 = arith.muli %arg0, %c512_i32 : i32
    %27 = vector.broadcast %26 : i32 to vector<5x512xi32>
    %28 = arith.addi %25, %27 : vector<5x512xi32>
    %c600_i32 = arith.constant 600 : i32
    %29 = vector.broadcast %c600_i32 : i32 to vector<5x512xi32>
    %30 = arith.cmpi slt, %28, %29 : vector<5x512xi32>
    %cst_18 = arith.constant 0.000000e+00 : f32
    %31 = vector.broadcast %cst_18 : f32 to vector<5x512xf32>
    %32 = arith.select %30, %24, %31 : vector<5x512xi1>, vector<5x512xf32>
    %c0_19 = arith.constant 0 : index
    %c0_20 = arith.constant 0 : index
    %33 = vector.load %arg8[%c0_19, %c0_20] : memref<5x512xf32, #tpu.memory_space<vmem>>, vector<5x512xf32>
    tpu.vector_store %arg8[%c0_19, %c0_20], %32 {strides = array<i32>} : memref<5x512xf32, #tpu.memory_space<vmem>>, vector<5x512xf32>,
    %cst_21 = arith.constant 0xFF800000 : f32
    %34 = vector.broadcast %cst_21 : f32 to vector<5x512xf32>
    %35 = arith.select %30, %32, %34 : vector<5x512xi1>, vector<5x512xf32>
    %cst_22 = arith.constant dense<0xFF800000> : vector<5xf32>
    %36 = vector.multi_reduction <maximumf>, %35, %cst_22 [1] : vector<5x512xf32> to vector<5xf32>
    %37 = vector.shape_cast %36 : vector<5xf32> to vector<5x1xf32>
    %38 = vector.broadcast %37 : vector<5x1xf32> to vector<5x512xf32>
    %39 = arith.subf %32, %38 : vector<5x512xf32>
    %40 = math.exp %39 : vector<5x512xf32>
    %cst_23 = arith.constant 0.000000e+00 : f32
    %41 = vector.broadcast %cst_23 : f32 to vector<5x512xf32>
    %42 = arith.select %30, %40, %41 : vector<5x512xi1>, vector<5x512xf32>
    %cst_24 = arith.constant dense<0.000000e+00> : vector<5xf32>
    %43 = vector.multi_reduction <add>, %42, %cst_24 [1] : vector<5x512xf32> to vector<5xf32>
    %44 = vector.shape_cast %43 : vector<5xf32> to vector<5x1xf32>
    %45 = vector.shape_cast %37 : vector<5x1xf32> to vector<1x5x1xf32>
    %c0_25 = arith.constant 0 : index
    %c0_26 = arith.constant 0 : index
    %c0_27 = arith.constant 0 : index
    %46 = vector.load %arg9[%c0_25, %c0_26, %c0_27] : memref<1x5x1xf32, #tpu.memory_space<vmem>>, vector<1x5x1xf32>
    tpu.vector_store %arg9[%c0_25, %c0_26, %c0_27], %45 {strides = array<i32>} : memref<1x5x1xf32, #tpu.memory_space<vmem>>, vector<1x5x1xf32>,
    %47 = vector.shape_cast %44 : vector<5x1xf32> to vector<1x5x1xf32>
    %c0_28 = arith.constant 0 : index
    %c0_29 = arith.constant 0 : index
    %c0_30 = arith.constant 0 : index
    %48 = vector.load %arg10[%c0_28, %c0_29, %c0_30] : memref<1x5x1xf32, #tpu.memory_space<vmem>>, vector<1x5x1xf32>
    tpu.vector_store %arg10[%c0_28, %c0_29, %c0_30], %47 {strides = array<i32>} : memref<1x5x1xf32, #tpu.memory_space<vmem>>, vector<1x5x1xf32>,
    return
  }
  func.func @transform_0(%arg0: i32) -> (i32, i32) {
    %c0_i32 = arith.constant 0 : i32
    %c0_i32_0 = arith.constant 0 : i32
    return %arg0, %c0_i32 : i32, i32
  }
  func.func @transform_1(%arg0: i32) -> (i32, i32) {
    %c0_i32 = arith.constant 0 : i32
    %c0_i32_0 = arith.constant 0 : i32
    %c0_i32_1 = arith.constant 0 : i32
    return %c0_i32, %c0_i32_0 : i32, i32
  }
  func.func @transform_2(%arg0: i32) -> (i32, i32) {
    %c0_i32 = arith.constant 0 : i32
    %c0_i32_0 = arith.constant 0 : i32
    %c0_i32_1 = arith.constant 0 : i32
    return %c0_i32, %c0_i32_0 : i32, i32
  }
  func.func @transform_3(%arg0: i32) -> (i32, i32) {
    %c0_i32 = arith.constant 0 : i32
    %c0_i32_0 = arith.constant 0 : i32
    %c0_i32_1 = arith.constant 0 : i32
    return %c0_i32, %c0_i32_0 : i32, i32
  }
  func.func @transform_4(%arg0: i32) -> (i32, i32) {
    %c0_i32 = arith.constant 0 : i32
    %c0_i32_0 = arith.constant 0 : i32
    %c0_i32_1 = arith.constant 0 : i32
    return %c0_i32, %c0_i32_0 : i32, i32
  }
  func.func @transform_5(%arg0: i32) -> (i32, i32) {
    %c0_i32 = arith.constant 0 : i32
    %c0_i32_0 = arith.constant 0 : i32
    %c0_i32_1 = arith.constant 0 : i32
    return %c0_i32, %c0_i32_0 : i32, i32
  }
  func.func @transform_6(%arg0: i32) -> (i32, i32) {
    %c0_i32 = arith.constant 0 : i32
    %c0_i32_0 = arith.constant 0 : i32
    %c0_i32_1 = arith.constant 0 : i32
    return %c0_i32, %c0_i32_0 : i32, i32
  }
  func.func @transform_7(%arg0: i32) -> (i32, i32) {
    %c0_i32 = arith.constant 0 : i32
    %c0_i32_0 = arith.constant 0 : i32
    return %c0_i32, %arg0 : i32, i32
  }
  func.func @transform_8(%arg0: i32) -> (i32, i32, i32) {
    %c0_i32 = arith.constant 0 : i32
    %c0_i32_0 = arith.constant 0 : i32
    %c0_i32_1 = arith.constant 0 : i32
    return %arg0, %c0_i32, %c0_i32_0 : i32, i32, i32
  }
  func.func @transform_9(%arg0: i32) -> (i32, i32, i32) {
    %c0_i32 = arith.constant 0 : i32
    %c0_i32_0 = arith.constant 0 : i32
    %c0_i32_1 = arith.constant 0 : i32
    return %arg0, %c0_i32, %c0_i32_0 : i32, i32, i32
  }
}

module attributes {stable_mosaic.version = 11 : i64} {
  func.func @softmax_norm_kernel(%arg0: i32, %arg1: memref<5x512xf32, #tpu.memory_space<vmem>>, %arg2: memref<5x1xf32, #tpu.memory_space<vmem>>, %arg3: memref<5x1xf32, #tpu.memory_space<vmem>>, %arg4: memref<5x512xf32, #tpu.memory_space<vmem>>) attributes {dimension_semantics = [#tpu.dimension_semantics<parallel>], iteration_bounds = array<i64: 2>, scalar_prefetch = 0 : i64, scratch_operands = 0 : i64, tpu.core_type = #tpu.core_type<tc>, window_params = [{transform_indices = @transform_0, window_bounds = array<i64: 5, 512>}, {pipeline_mode = #tpu.pipeline_mode<synchronous>, transform_indices = @transform_1, window_bounds = array<i64: 5, 1>}, {pipeline_mode = #tpu.pipeline_mode<synchronous>, transform_indices = @transform_2, window_bounds = array<i64: 5, 1>}, {transform_indices = @transform_3, window_bounds = array<i64: 5, 512>}]} {
    %c0 = arith.constant 0 : index
    %c0_0 = arith.constant 0 : index
    %0 = vector.load %arg1[%c0, %c0_0] : memref<5x512xf32, #tpu.memory_space<vmem>>, vector<5x512xf32>
    %c0_1 = arith.constant 0 : index
    %c0_2 = arith.constant 0 : index
    %1 = vector.load %arg2[%c0_1, %c0_2] : memref<5x1xf32, #tpu.memory_space<vmem>>, vector<5x1xf32>
    %2 = vector.broadcast %1 : vector<5x1xf32> to vector<5x512xf32>
    %3 = arith.subf %0, %2 : vector<5x512xf32>
    %4 = math.exp %3 : vector<5x512xf32>
    %c0_3 = arith.constant 0 : index
    %c0_4 = arith.constant 0 : index
    %5 = vector.load %arg3[%c0_3, %c0_4] : memref<5x1xf32, #tpu.memory_space<vmem>>, vector<5x1xf32>
    %6 = vector.broadcast %5 : vector<5x1xf32> to vector<5x512xf32>
    %7 = arith.mulf %4, %6 : vector<5x512xf32>
    %c0_5 = arith.constant 0 : index
    %c0_6 = arith.constant 0 : index
    %8 = vector.load %arg4[%c0_5, %c0_6] : memref<5x512xf32, #tpu.memory_space<vmem>>, vector<5x512xf32>
    tpu.vector_store %arg4[%c0_5, %c0_6], %7 {strides = array<i32>} : memref<5x512xf32, #tpu.memory_space<vmem>>, vector<5x512xf32>,
    return
  }
  func.func @transform_0(%arg0: i32) -> (i32, i32) {
    %c0_i32 = arith.constant 0 : i32
    %c0_i32_0 = arith.constant 0 : i32
    return %c0_i32, %arg0 : i32, i32
  }
  func.func @transform_1(%arg0: i32) -> (i32, i32) {
    %c0_i32 = arith.constant 0 : i32
    %c0_i32_0 = arith.constant 0 : i32
    %c0_i32_1 = arith.constant 0 : i32
    return %c0_i32, %c0_i32_0 : i32, i32
  }
  func.func @transform_2(%arg0: i32) -> (i32, i32) {
    %c0_i32 = arith.constant 0 : i32
    %c0_i32_0 = arith.constant 0 : i32
    %c0_i32_1 = arith.constant 0 : i32
    return %c0_i32, %c0_i32_0 : i32, i32
  }
  func.func @transform_3(%arg0: i32) -> (i32, i32) {
    %c0_i32 = arith.constant 0 : i32
    %c0_i32_0 = arith.constant 0 : i32
    return %c0_i32, %arg0 : i32, i32
  }
}

</mosaic_0001>

<bundles_post_ra>
// kernel: ffnet_forward.3
= control target key start
LH: loop header
LB: loop body
LE: loop exit
PB: predicated region body
PF: predicated region fallthrough
CT: control target
= control target key end

     0   :  { %s324_s12 = smov 0   ;;  %s347_s0 = inlined_call_operand.vmem [shape: f32[5,1024], index: 0, kind: input, shape index: {}]   ;;  %s348_s1 = inlined_call_operand.vmem [shape: f32[5,1], index: 1, kind: input, shape index: {}]   ;;  %s349_s2 = inlined_call_operand.vmem [shape: f32[5,1], index: 2, kind: input, shape index: {}]   ;;  %s350_s3 = inlined_call_operand.vmem [shape: f32[5,1024], index: 3, kind: output, shape index: {}]  }
   0x1 LB: > { %s266_s13 = sadd.s32 4294967295, %s301_s12   ;;  %p270_p0 = scmp.ge.s32.totalorder %s301_s12, 1  ;;  %s301_s12 = sphi %s324_s12, %s13_s12  }
   0x2   : > { %p138_p1 = scmp.lt.s32.totalorder %s301_s12, 3 }
   0x4   : > { %p139_p2 = pnand %p270_p0, %p138_p1 }
   0x5   : > { %v178_v0 = vld [vmem:[%s348_s1] sm:$0x1f] (!%p139_p2)  ;;  %v303_v1 = vmov (!%p139_p2), 0   ;;  %s271_s18 = sshll.u32 (!%p139_p2), %s266_s13, 2 }
   0x6   : > { %142 = sbr.rel (%p139_p2) target bundleno = 156 (0x9c), region = 32  ;;  %286 = vset.pattern.permute.xlu0 (!%p139_p2), %v303_v1  ;;  %v196_v2 = vld [vmem:[%s349_s2] sm:$0x1f] (!%p139_p2)  ;;  %p163_p3 = scmp.lt.s32.totalorder (!%p139_p2), %s271_s18, 7 }
   0x7   : > { %181 = vperm.xlu0 (!%p139_p2), %286, %v178_v0  }
   0xb   : > { %199 = vperm.xlu0 (!%p139_p2), %286, %v196_v2  }
   0xd   : > { %s352_s18 = smov (!%p163_p3, %s271_s18), 7 }
   0xe   : > { %s272_s19 = sshll.u32 %s352_s18, 3 }
   0xf   : > { %s166_s22 = scalar_lea.vmem %s347_s0, %s272_s19  ;;  %s172_s25 = scalar_lea.vmem %s350_s3, %s272_s19 }
  0x10   : > { %v174_v3 = vld [vmem:[%s166_s22] sm:$0x1f]  ;;  %v175_v4 = vld [vmem:[%s166_s22 + $0x8] sm:$0x1f]  ;;  %v176_v5 = vld [vmem:[%s166_s22 + $0x10] sm:$0x1f] }
  0x11   : > { %v177_v6 = vld [vmem:[%s166_s22 + $0x18] sm:$0x1f] }
  0x86   : > { %v182_v7 = vpop.permute.xlu0 %181 }
  0x87   : > { %v184_v8 = vsub.f32 %v174_v3, %v182_v7  ;;  %v185_v9 = vsub.f32 %v175_v4, %v182_v7  ;;  %v186_v10 = vsub.f32 %v176_v5, %v182_v7  ;;  %v187_v11 = vsub.f32 %v177_v6, %v182_v7 }
  0x89   : > { %v188_v12 = vmul.f32 1.442695, %v184_v8  ;;  %v190_v13 = vmul.f32 1.442695, %v185_v9  ;;  %v192_v14 = vmul.f32 1.442695, %v186_v10 }
  0x8a   : > { %v194_v15 = vmul.f32 1.442695, %v187_v11  ;;  %v200_v17 = vpop.permute.xlu0 %199 }
  0x8b   : > { %287 = vpow2.f32 %v188_v12 }
  0x8c   : > { %289 = vpow2.f32 %v190_v13 }
  0x8d   : > { %291 = vpow2.f32 %v192_v14 }
  0x8e   : > { %293 = vpow2.f32 %v194_v15 }
  0x95   : > { %v288_v16 = vpop.eup %287 }
  0x96   : > { %v290_v18 = vpop.eup %289  ;;  %v202_v19 = vmul.f32 %v288_v16, %v200_v17 }
  0x97   : > { %v292_v20 = vpop.eup %291  ;;  %v203_v21 = vmul.f32 %v290_v18, %v200_v17 }
  0x98   : > { %v294_v22 = vpop.eup %293  ;;  %v204_v23 = vmul.f32 %v292_v20, %v200_v17  ;;  %206 = vst [vmem:[%s172_s25] sm:$0x1f] %v202_v19 }
  0x99   : > { %v205_v24 = vmul.f32 %v294_v22, %v200_v17  ;;  %207 = vst [vmem:[%s172_s25 + $0x8] sm:$0x1f] %v203_v21 }
  0x9a   : > { %208 = vst [vmem:[%s172_s25 + $0x10] sm:$0x1f] %v204_v23 }
  0x9b   : > { %209 = vst [vmem:[%s172_s25 + $0x18] sm:$0x1f] %v205_v24 }
  0x9c PF: > { %s13_s12 = sadd.s32 1, %s301_s12  }
  0x9d   : > { %p10_p4 = scmp.ge.s32.totalorder %s13_s12, 4  }
  0x9f   :  { %12 = sbr.rel (!%p10_p4) target bundleno = 1 (0x1), region = 62 }

// kernel: ffnet_forward.2
= control target key start
LH: loop header
LB: loop body
LE: loop exit
PB: predicated region body
PF: predicated region fallthrough
CT: control target
= control target key end

     0   :  { %s1960_s30 = smov 0   ;;  %s2343_s0 = inlined_call_operand.vmem [shape: f32[600,55], index: 0, kind: input, shape index: {}]   ;;  %s2344_s1 = inlined_call_operand.vmem [shape: bf16[100,55], index: 1, kind: input, shape index: {}]   ;;  %s2345_s2 = inlined_call_operand.vmem [shape: f32[100,1], index: 2, kind: input, shape index: {}]   ;;  %s2346_s3 = inlined_call_operand.vmem [shape: bf16[100,100], index: 3, kind: input, shape index: {}]   ;;  %s2347_s4 = inlined_call_operand.vmem [shape: f32[100,1], index: 4, kind: input, shape index: {}]   ;;  %s2348_s5 = inlined_call_operand.vmem [shape: bf16[5,100], index: 5, kind: input, shape index: {}]   ;;  %s2349_s6 = inlined_call_operand.vmem [shape: f32[5,1], index: 6, kind: input, shape index: {}]   ;;  %s2350_s7 = inlined_call_operand.vmem [shape: f32[5,1024], index: 7, kind: output, shape index: {0}]   ;;  %s2351_s8 = inlined_call_operand.vmem [shape: f32[2,5,1], index: 8, kind: output, shape index: {1}]   ;;  %s2352_s9 = inlined_call_operand.vmem [shape: f32[2,5,1], index: 9, kind: output, shape index: {2}]  }
   0x1 LB: > { %s1966_s10 = sadd.s32 4294967295, %s1907_s30   ;;  %p1734_p0 = scmp.ge.s32.totalorder %s1907_s30, 1  ;;  %s1907_s30 = sphi %s1960_s30, %s20_s30  }
   0x2   : > { %p301_p1 = scmp.lt.s32.totalorder %s1907_s30, 3 }
   0x4   : > { %p302_p2 = pnand %p1734_p0, %p301_p1 }
   0x5   : > { %s1735_s11 = sshll.u32 (!%p302_p2), %s1966_s10, 6  ;;  %v1974_v0 = vld [vmem:[%s2344_s1] sm:$0xff] (!%p302_p2)   ;;  %vm598_vm0 = vcmask (!%p302_p2), 449536   ;;  %v1909_v1 = vmov (!%p302_p2), 0   ;;  %v488_v3 = vld [vmem:[%s2345_s2 + $0x8] sm:$0xff] (!%p302_p2)  ;;  %v489_v57 = vld [vmem:[%s2345_s2 + $0x10] sm:$0xff] (!%p302_p2) }
   0x6   : > { %305 = sbr.rel (%p302_p2) target bundleno = 1160 (0x488), region = 48  ;;  %p354_p3 = scmp.lt.s32.totalorder (!%p302_p2), %s1735_s11, 74  ;;  %1808 = vmatprep.mubr.msk.bf16.mxu0 (!%p302_p2), %vm598_vm0, %v1974_v0  ;;  %1838 = vmatprep.mubr.msk.bf16.mxu1 (!%p302_p2), %vm598_vm0, %v1974_v0  ;;  %v487_v2 = vld [vmem:[%s2345_s2] sm:$0xff] (!%p302_p2)  ;;  %v493_v61 = vld [vmem:[%s2345_s2 + $0x30] sm:$0xff] (!%p302_p2)  ;;  %vm1144_vm1 = vcmask (!%p302_p2), 1041408   ;;  %vm1122_vm2 = vcmask (!%p302_p2), 818176  }
   0x7   : > { %1877 = vset.pattern.permute.xlu0 (!%p302_p2), %v1909_v1  ;;  %1878 = vset.pattern.permute.xlu1 (!%p302_p2), %v1909_v1  ;;  %v491_v16 = vld [vmem:[%s2345_s2 + $0x20] sm:$0xff] (!%p302_p2)  ;;  %s1737_s25 = sshll.u32 (!%p302_p2), %s1966_s10, 2  ;;  %s1789_s26 = sshll.u32 (!%p302_p2), %s1966_s10, 9  ;;  %vm1574_vm5 = vcmask (!%p302_p2), 1044480   ;;  %vm1609_vm8 = vcmask (!%p302_p2), 4096  }
   0x8   : > { %502 = vperm.xlu0 (!%p302_p2), %1877, %v487_v2   ;;  %512 = vperm.xlu1 (!%p302_p2), %1878, %v489_v57   ;;  %v1013_v57 = vld [vmem:[%s2347_s4 + $0x10] sm:$0xff] (!%p302_p2)  ;;  %p364_p4 = scmp.lt.s32.totalorder (!%p302_p2), %s1737_s25, 7  ;;  %p369_p5 = scmp.lt.s32.totalorder (!%p302_p2), %s1966_s10, 1 }
   0xc   : > { %507 = vperm.xlu0 (!%p302_p2), %1877, %v488_v3  }
   0xd   : > { %s2354_s11 = smov (!%p354_p3, %s1735_s11), 74  ;;  %s2356_s25 = smov (!%p364_p4, %s1737_s25), 7 }
   0xe   : > { %s1736_s16 = sshll.u32 %s2354_s11, 3  ;;  %s1738_s27 = sshll.u32 %s2356_s25, 3 }
   0xf   : > { %s1988_s19 = scalar_lea.vmem %s2343_s0, %s1736_s16  ;;  %s367_s11 = scalar_lea.vmem %s2350_s7, %s1738_s27 }
  0x10   : > { %v394_v4 = vld [vmem:[%s1988_s19 + $0x80] sm:$0xff]  ;;  %v395_v5 = vld [vmem:[%s1988_s19 + $0x88] sm:$0xff]  ;;  %v396_v15 = vld [vmem:[%s1988_s19 + $0x90] sm:$0xff]  ;;  %522 = vperm.xlu0 %1877, %v491_v16   ;;  %s2358_s10 = smov (!%p369_p5, %s1966_s10), 1 }
  0x11   : > { %v426_v6 = vld [vmem:[%s1988_s19 + $0x180] sm:$0xff]  ;;  %v450_v7 = vpack.c.bf16 %v395_v5, %v394_v4  ;;  %v427_v8 = vld [vmem:[%s1988_s19 + $0x188] sm:$0xff]  ;;  %v397_v18 = vld [vmem:[%s1988_s19 + $0x98] sm:$0xff]  ;;  %s1739_s12 = sshll.u32 %s2358_s10, 3 }
  0x12   : > { %v378_v9 = vld [vmem:[%s1988_s19] sm:$0xff]  ;;  %v379_v10 = vld [vmem:[%s1988_s19 + $0x8] sm:$0xff]  ;;  %v466_v11 = vpack.c.bf16 %v427_v8, %v426_v6  ;;  %v428_v19 = vld [vmem:[%s1988_s19 + $0x190] sm:$0xff]  ;;  %v451_v22 = vpack.c.bf16 %v397_v18, %v396_v15  ;;  %s372_s15 = scalar_lea.vmem %s2351_s8, %s1739_s12  ;;  %s376_s18 = scalar_lea.vmem %s2352_s9, %s1739_s12 }
  0x13   : > { %v442_v12 = vpack.c.bf16 %v379_v10, %v378_v9  ;;  %v410_v13 = vld [vmem:[%s1988_s19 + $0x100] sm:$0xff]  ;;  %v411_v14 = vld [vmem:[%s1988_s19 + $0x108] sm:$0xff]  ;;  %1852 = vmatprep.subr.msk.bf16.mxu0 %vm598_vm0, %v450_v7  ;;  %v429_v20 = vld [vmem:[%s1988_s19 + $0x198] sm:$0xff] }
  0x14   : > { %v458_v17 = vpack.c.bf16 %v411_v14, %v410_v13  ;;  %1860 = vmatprep.subr.msk.bf16.mxu1 %vm598_vm0, %v466_v11  ;;  %v467_v23 = vpack.c.bf16 %v429_v20, %v428_v19  ;;  %v380_v24 = vld [vmem:[%s1988_s19 + $0x10] sm:$0xff]  ;;  %v381_v25 = vld [vmem:[%s1988_s19 + $0x18] sm:$0xff]  ;;  %v398_v31 = vld [vmem:[%s1988_s19 + $0xa0] sm:$0xff]  ;;  %532 = vperm.xlu0 %1877, %v493_v61  }
  0x15   : > { %v621_v21 = vsel %vm598_vm0, %v442_v12, 0  ;;  %v412_v26 = vld [vmem:[%s1988_s19 + $0x110] sm:$0xff]  ;;  %v413_v28 = vld [vmem:[%s1988_s19 + $0x118] sm:$0xff]  ;;  %v443_v29 = vpack.c.bf16 %v381_v25, %v380_v24  ;;  %v399_v32 = vld [vmem:[%s1988_s19 + $0xa8] sm:$0xff] }
  0x16   : > { %1793 = vmatpush3.bf16.xpose.msra.mxu0 %v621_v21  ;;  %v669_v27 = vsel %vm598_vm0, %v458_v17, 0  ;;  %v459_v30 = vpack.c.bf16 %v413_v28, %v412_v26  ;;  %v430_v33 = vld [vmem:[%s1988_s19 + $0x1a0] sm:$0xff]  ;;  %v431_v34 = vld [vmem:[%s1988_s19 + $0x1a8] sm:$0xff]  ;;  %v452_v36 = vpack.c.bf16 %v399_v32, %v398_v31  ;;  %v400_v45 = vld [vmem:[%s1988_s19 + $0xb0] sm:$0xff] }
  0x17   : > { %1823 = vmatpush3.bf16.xpose.msra.mxu1 %v669_v27  ;;  %1853 = vmatprep.subr.msk.bf16.mxu0 %vm598_vm0, %v451_v22  ;;  %v624_v35 = vsel %vm598_vm0, %v443_v29, 0  ;;  %v468_v38 = vpack.c.bf16 %v431_v34, %v430_v33  ;;  %v382_v39 = vld [vmem:[%s1988_s19 + $0x20] sm:$0xff]  ;;  %v383_v40 = vld [vmem:[%s1988_s19 + $0x28] sm:$0xff]  ;;  %v401_v46 = vld [vmem:[%s1988_s19 + $0xb8] sm:$0xff] }
  0x18   : > { %1861 = vmatprep.subr.msk.bf16.mxu1 %vm598_vm0, %v467_v23  ;;  %v672_v37 = vsel %vm598_vm0, %v459_v30, 0  ;;  %v414_v41 = vld [vmem:[%s1988_s19 + $0x120] sm:$0xff]  ;;  %v415_v42 = vld [vmem:[%s1988_s19 + $0x128] sm:$0xff]  ;;  %v444_v43 = vpack.c.bf16 %v383_v40, %v382_v39  ;;  %v432_v47 = vld [vmem:[%s1988_s19 + $0x1b0] sm:$0xff]  ;;  %v453_v50 = vpack.c.bf16 %v401_v46, %v400_v45 }
  0x19   : > { %v460_v44 = vpack.c.bf16 %v415_v42, %v414_v41  ;;  %v433_v48 = vld [vmem:[%s1988_s19 + $0x1b8] sm:$0xff]  ;;  %v384_v53 = vld [vmem:[%s1988_s19 + $0x30] sm:$0xff]  ;;  %v402_v59 = vld [vmem:[%s1988_s19 + $0xc0] sm:$0xff] }
  0x1a   : > { %v627_v49 = vsel %vm598_vm0, %v444_v43, 0  ;;  %v469_v52 = vpack.c.bf16 %v433_v48, %v432_v47  ;;  %v385_v54 = vld [vmem:[%s1988_s19 + $0x38] sm:$0xff]  ;;  %v416_v55 = vld [vmem:[%s1988_s19 + $0x130] sm:$0xff]  ;;  %v403_v60 = vld [vmem:[%s1988_s19 + $0xc8] sm:$0xff] }
  0x1b   : > { %v675_v51 = vsel %vm598_vm0, %v460_v44, 0  ;;  %v417_v56 = vld [vmem:[%s1988_s19 + $0x138] sm:$0xff]  ;;  %v445_v58 = vpack.c.bf16 %v385_v54, %v384_v53  ;;  %v386_v63 = vld [vmem:[%s1988_s19 + $0x40] sm:$0xff]  ;;  %v387_v2 = vld [vmem:[%s1988_s19 + $0x48] sm:$0xff]  ;;  %v454_v8 = vpack.c.bf16 %v403_v60, %v402_v59 }
  0x1c   : > { %v461_v62 = vpack.c.bf16 %v417_v56, %v416_v55  ;;  %v434_v3 = vld [vmem:[%s1988_s19 + $0x1c0] sm:$0xff]  ;;  %v435_v4 = vld [vmem:[%s1988_s19 + $0x1c8] sm:$0xff]  ;;  %v490_v5 = vld [vmem:[%s2345_s2 + $0x18] sm:$0xff]  ;;  %v446_v9 = vpack.c.bf16 %v387_v2, %v386_v63 }
  0x1d   : > { %v495_v6 = vld [vmem:[%s2345_s2 + $0x40] sm:$0xff]  ;;  %v630_v7 = vsel %vm598_vm0, %v445_v58, 0  ;;  %v470_v11 = vpack.c.bf16 %v435_v4, %v434_v3  ;;  %517 = vperm.xlu1 %1878, %v490_v5   ;;  %v419_v13 = vld [vmem:[%s1988_s19 + $0x148] sm:$0xff]  ;;  %v404_v15 = vld [vmem:[%s1988_s19 + $0xd0] sm:$0xff] }
  0x1e   : > { %1795 = vmatpush3.bf16.xpose.msra.mxu0 %v624_v35  ;;  %v678_v10 = vsel %vm598_vm0, %v461_v62, 0  ;;  %v418_v12 = vld [vmem:[%s1988_s19 + $0x140] sm:$0xff]  ;;  %542 = vperm.xlu0 %1877, %v495_v6   ;;  %v492_v14 = vld [vmem:[%s2345_s2 + $0x28] sm:$0xff]  ;;  %v405_v16 = vld [vmem:[%s1988_s19 + $0xd8] sm:$0xff]  ;;  %v633_v18 = vsel %vm598_vm0, %v446_v9, 0 }
  0x1f   : > { %1825 = vmatpush3.bf16.xpose.msra.mxu1 %v672_v37  ;;  %1854 = vmatprep.subr.msk.bf16.mxu0 %vm598_vm0, %v452_v36  ;;  %v497_v17 = vld [vmem:[%s2345_s2 + $0x50] sm:$0xff]  ;;  %v437_v20 = vld [vmem:[%s1988_s19 + $0x1d8] sm:$0xff]  ;;  %v462_v22 = vpack.c.bf16 %v419_v13, %v418_v12  ;;  %v499_v23 = vld [vmem:[%s2345_s2 + $0x60] sm:$0xf]  ;;  %v455_v24 = vpack.c.bf16 %v405_v16, %v404_v15 }
  0x20   : > { %1862 = vmatprep.subr.msk.bf16.mxu1 %vm598_vm0, %v468_v38  ;;  %v436_v19 = vld [vmem:[%s1988_s19 + $0x1d0] sm:$0xff]  ;;  %v494_v21 = vld [vmem:[%s2345_s2 + $0x38] sm:$0xff]  ;;  %v496_v31 = vld [vmem:[%s2345_s2 + $0x48] sm:$0xff] }
  0x21   : > { %527 = vperm.xlu1 %1878, %v492_v14   ;;  %v681_v25 = vsel %vm598_vm0, %v462_v22, 0  ;;  %v471_v26 = vpack.c.bf16 %v437_v20, %v436_v19  ;;  %v388_v27 = vld [vmem:[%s1988_s19 + $0x50] sm:$0xff]  ;;  %v389_v28 = vld [vmem:[%s1988_s19 + $0x58] sm:$0xff]  ;;  %v1012_v32 = vld [vmem:[%s2347_s4 + $0x8] sm:$0xff] }
  0x22   : > { %552 = vperm.xlu0 %1877, %v497_v17   ;;  %v420_v29 = vld [vmem:[%s1988_s19 + $0x150] sm:$0xff]  ;;  %v421_v30 = vld [vmem:[%s1988_s19 + $0x158] sm:$0xff]  ;;  %v447_v33 = vpack.c.bf16 %v389_v28, %v388_v27  ;;  %v406_v35 = vld [vmem:[%s1988_s19 + $0xe0] sm:$0xff] }
  0x23   : > { %v463_v34 = vpack.c.bf16 %v421_v30, %v420_v29  ;;  %v407_v36 = vld [vmem:[%s1988_s19 + $0xe8] sm:$0xff]  ;;  %v438_v37 = vld [vmem:[%s1988_s19 + $0x1e0] sm:$0xff]  ;;  %v498_v39 = vld [vmem:[%s2345_s2 + $0x58] sm:$0xff] }
  0x24   : > { %v439_v38 = vld [vmem:[%s1988_s19 + $0x1e8] sm:$0xff]  ;;  %v1014_v40 = vld [vmem:[%s2347_s4 + $0x18] sm:$0xff]  ;;  %v636_v41 = vsel %vm598_vm0, %v447_v33, 0  ;;  %v456_v42 = vpack.c.bf16 %v407_v36, %v406_v35  ;;  %v390_v45 = vld [vmem:[%s1988_s19 + $0x60] sm:$0xff] }
  0x25   : > { %537 = vperm.xlu1 %1878, %v494_v21   ;;  %v684_v43 = vsel %vm598_vm0, %v463_v34, 0  ;;  %v472_v44 = vpack.c.bf16 %v439_v38, %v438_v37  ;;  %v391_v46 = vld [vmem:[%s1988_s19 + $0x68] sm:$0xff]  ;;  %v422_v47 = vld [vmem:[%s1988_s19 + $0x160] sm:$0xff]  ;;  %v408_v53 = vld [vmem:[%s1988_s19 + $0xf0] sm:$0xff] }
  0x26   : > { %1797 = vmatpush3.bf16.xpose.msra.mxu0 %v627_v49  ;;  %562 = vperm.xlu0 %1877, %v499_v23   ;;  %v423_v48 = vld [vmem:[%s1988_s19 + $0x168] sm:$0xff]  ;;  %v1011_v49 = vld [vmem:[%s2347_s4] sm:$0xff]  ;;  %v409_v54 = vld [vmem:[%s1988_s19 + $0xf8] sm:$0xff] }
  0x27   : > { %1827 = vmatpush3.bf16.xpose.msra.mxu1 %v675_v51  ;;  %1855 = vmatprep.subr.msk.bf16.mxu0 %vm598_vm0, %v453_v50  ;;  %v1016_v50 = vld [vmem:[%s2347_s4 + $0x28] sm:$0xff]  ;;  %v448_v51 = vpack.c.bf16 %v391_v46, %v390_v45  ;;  %v440_v55 = vld [vmem:[%s1988_s19 + $0x1f0] sm:$0xff]  ;;  %v441_v56 = vld [vmem:[%s1988_s19 + $0x1f8] sm:$0xff]  ;;  %v457_v60 = vpack.c.bf16 %v409_v54, %v408_v53 }
  0x28   : > { %1863 = vmatprep.subr.msk.bf16.mxu1 %vm598_vm0, %v469_v52  ;;  %v464_v52 = vpack.c.bf16 %v423_v48, %v422_v47  ;;  %v1018_v58 = vld [vmem:[%s2347_s4 + $0x38] sm:$0xff]  ;;  %v473_v62 = vpack.c.bf16 %v441_v56, %v440_v55  ;;  %v392_v63 = vld [vmem:[%s1988_s19 + $0x70] sm:$0xff]  ;;  %v1015_v5 = vld [vmem:[%s2347_s4 + $0x20] sm:$0xff] }
  0x29   : > { %547 = vperm.xlu1 %1878, %v496_v31   ;;  %v639_v59 = vsel %vm598_vm0, %v448_v51, 0  ;;  %v393_v2 = vld [vmem:[%s1988_s19 + $0x78] sm:$0xff]  ;;  %v424_v3 = vld [vmem:[%s1988_s19 + $0x170] sm:$0xff]  ;;  %v1020_v6 = vld [vmem:[%s2347_s4 + $0x48] sm:$0xff] }
  0x2a   : > { %1031 = vperm.xlu0 %1877, %v1012_v32   ;;  %v687_v61 = vsel %vm598_vm0, %v464_v52, 0  ;;  %v425_v4 = vld [vmem:[%s1988_s19 + $0x178] sm:$0xff]  ;;  %v1017_v9 = vld [vmem:[%s2347_s4 + $0x30] sm:$0xff]  ;;  %v1019_v13 = vld [vmem:[%s2347_s4 + $0x40] sm:$0xff] }
  0x2b   : > { %v1440_v14 = vld [vmem:[%s2349_s6] sm:$0x1f]  ;;  %v1021_v15 = vld [vmem:[%s2347_s4 + $0x50] sm:$0xff]  ;;  %v1880_v16 = vld [vmem:[%s2344_s1 + $0x8] sm:$0xff]  }
  0x2c   : > { %v1023_v17 = vld [vmem:[%s2347_s4 + $0x60] sm:$0xf]  ;;  %v1884_v20 = vld [vmem:[%s2344_s1 + $0x28] sm:$0xff]   ;;  %v1885_v21 = vld [vmem:[%s2344_s1 + $0x30] ss:$0 sps:$4 sm:$0x33]  }
  0x2d   : > { %557 = vperm.xlu1 %1878, %v498_v39   ;;  %v1883_v19 = vld [vmem:[%s2344_s1 + $0x20] sm:$0xff]  }
  0x2e   : > { %1799 = vmatpush3.bf16.xpose.msra.mxu0 %v630_v7  ;;  %1041 = vperm.xlu0 %1877, %v1014_v40   ;;  %v449_v7 = vpack.c.bf16 %v393_v2, %v392_v63 }
  0x2f   : > { %1829 = vmatpush3.bf16.xpose.msra.mxu1 %v678_v10  ;;  %1856 = vmatprep.subr.msk.bf16.mxu0 %vm598_vm0, %v454_v8  ;;  %v465_v8 = vpack.c.bf16 %v425_v4, %v424_v3  ;;  %v1022_v10 = vld [vmem:[%s2347_s4 + $0x58] sm:$0xff] }
  0x30   : > { %1864 = vmatprep.subr.msk.bf16.mxu1 %vm598_vm0, %v470_v11  ;;  %v642_v11 = vsel %vm598_vm0, %v449_v7, 0 }
  0x31   : > { %1026 = vperm.xlu1 %1878, %v1011_v49   ;;  %v690_v12 = vsel %vm598_vm0, %v465_v8, 0 }
  0x32   : > { %1051 = vperm.xlu0 %1877, %v1016_v50  }
  0x35   : > { %1036 = vperm.xlu1 %1878, %v1013_v57  }
  0x36   : > { %1801 = vmatpush3.bf16.xpose.msra.mxu0 %v633_v18  ;;  %1061 = vperm.xlu0 %1877, %v1018_v58   ;;  %v1881_v18 = vld [vmem:[%s2344_s1 + $0x10] sm:$0xff]  }
  0x37   : > { %1831 = vmatpush3.bf16.xpose.msra.mxu1 %v681_v25  ;;  %1857 = vmatprep.subr.msk.bf16.mxu0 %vm598_vm0, %v455_v24 }
  0x38   : > { %1865 = vmatprep.subr.msk.bf16.mxu1 %vm598_vm0, %v471_v26 }
  0x39   : > { %1046 = vperm.xlu1 %1878, %v1015_v5  }
  0x3a   : > { %1071 = vperm.xlu0 %1877, %v1020_v6  }
  0x3d   : > { %1056 = vperm.xlu1 %1878, %v1017_v9  }
  0x3e   : > { %1803 = vmatpush3.bf16.xpose.msra.mxu0 %v636_v41  ;;  %1081 = vperm.xlu0 %1877, %v1022_v10  }
  0x3f   : > { %1833 = vmatpush3.bf16.xpose.msra.mxu1 %v684_v43  ;;  %1858 = vmatprep.subr.msk.bf16.mxu0 %vm598_vm0, %v456_v42 }
  0x40   : > { %1866 = vmatprep.subr.msk.bf16.mxu1 %vm598_vm0, %v472_v44 }
  0x41   : > { %1066 = vperm.xlu1 %1878, %v1019_v13  }
  0x42   : > { %1443 = vperm.xlu0 %1877, %v1440_v14  }
  0x45   : > { %1076 = vperm.xlu1 %1878, %v1021_v15  }
  0x46   : > { %1805 = vmatpush3.bf16.xpose.msra.mxu0 %v639_v59 }
  0x47   : > { %1835 = vmatpush3.bf16.xpose.msra.mxu1 %v687_v61  ;;  %1859 = vmatprep.subr.msk.bf16.mxu0 %vm598_vm0, %v457_v60 }
  0x48   : > { %1867 = vmatprep.subr.msk.bf16.mxu1 %vm598_vm0, %v473_v62 }
  0x49   : > { %1086 = vperm.xlu1 %1878, %v1023_v17  }
  0x4e   : > { %1807 = vmatpush3.bf16.xpose.msra.mxu0 %v642_v11 }
  0x4f   : > { %1837 = vmatpush3.bf16.xpose.msra.mxu1 %v690_v12 }
  0x55   : > { %1809 = vmatmul.mubr.msk.bf16.vlgmr.msra.gmra.mrb[0].mxu0 %vm598_vm0, %v1974_v0 }
  0x56   : > { %1839 = vmatmul.mubr.msk.bf16.vlgmr.msra.gmra.mrb[0].mxu1 %vm598_vm0, %v1974_v0  ;;  %1810 = vmatprep.mubr.msk.bf16.mxu0 %vm598_vm0, %v1880_v16  ;;  %v1882_v0 = vld [vmem:[%s2344_s1 + $0x18] sm:$0xff]  }
  0x57   : > { %1840 = vmatprep.mubr.msk.bf16.mxu1 %vm598_vm0, %v1880_v16 }
  0x5d   : > { %1811 = vmatmul.mubr.msk.bf16.gmra.mrb[4].mxu0 %vm598_vm0, %v1880_v16 }
  0x5e   : > { %1841 = vmatmul.mubr.msk.bf16.gmra.mrb[4].mxu1 %vm598_vm0, %v1880_v16  ;;  %1812 = vmatprep.mubr.msk.bf16.mxu0 %vm598_vm0, %v1881_v18 }
  0x5f   : > { %1842 = vmatprep.mubr.msk.bf16.mxu1 %vm598_vm0, %v1881_v18 }
  0x65   : > { %1813 = vmatmul.mubr.msk.bf16.gmra.mrb[8].mxu0 %vm598_vm0, %v1881_v18 }
  0x66   : > { %1843 = vmatmul.mubr.msk.bf16.gmra.mrb[8].mxu1 %vm598_vm0, %v1881_v18  ;;  %1814 = vmatprep.mubr.msk.bf16.mxu0 %vm598_vm0, %v1882_v0 }
  0x67   : > { %1844 = vmatprep.mubr.msk.bf16.mxu1 %vm598_vm0, %v1882_v0 }
  0x6d   : > { %1815 = vmatmul.mubr.msk.bf16.gmra.mrb[12].mxu0 %vm598_vm0, %v1882_v0 }
  0x6e   : > { %1845 = vmatmul.mubr.msk.bf16.gmra.mrb[12].mxu1 %vm598_vm0, %v1882_v0  ;;  %1816 = vmatprep.mubr.msk.bf16.mxu0 %vm598_vm0, %v1883_v19 }
  0x6f   : > { %1846 = vmatprep.mubr.msk.bf16.mxu1 %vm598_vm0, %v1883_v19 }
  0x75   : > { %1817 = vmatmul.mubr.msk.bf16.gmra.mrb[16].mxu0 %vm598_vm0, %v1883_v19 }
  0x76   : > { %1847 = vmatmul.mubr.msk.bf16.gmra.mrb[16].mxu1 %vm598_vm0, %v1883_v19  ;;  %1818 = vmatprep.mubr.msk.bf16.mxu0 %vm598_vm0, %v1884_v20 }
  0x77   : > { %1848 = vmatprep.mubr.msk.bf16.mxu1 %vm598_vm0, %v1884_v20 }
  0x7d   : > { %1819 = vmatmul.mubr.msk.bf16.gmra.mrb[20].mxu0 %vm598_vm0, %v1884_v20 }
  0x7e   : > { %1849 = vmatmul.mubr.msk.bf16.gmra.mrb[20].mxu1 %vm598_vm0, %v1884_v20  ;;  %1820 = vmatprep.mubr.msk.bf16.mxu0 %vm598_vm0, %v1885_v21 }
  0x7f   : > { %1850 = vmatprep.mubr.msk.bf16.mxu1 %vm598_vm0, %v1885_v21 }
  0x85   : > { %1821 = vmatmul.mubr.msk.bf16.gmra.mrb[24].mxu0 %vm598_vm0, %v1885_v21 }
  0x86   : > { %1851 = vmatmul.mubr.msk.bf16.gmra.mrb[24].mxu1 %vm598_vm0, %v1885_v21  ;;  %1189 = vmatprep.mubr.bf16.mxu0 %v1909_v1 }
  0x87   : > { %1290 = vmatprep.mubr.bf16.mxu1 %v1909_v1  ;;  %v503_v22 = vpop.permute.xlu0 %502  ;;  %v513_v24 = vpop.permute.xlu1 %512 }
  0x8b   : > { %v508_v23 = vpop.permute.xlu0 %507 }
  0x8f   : > { %v523_v14 = vpop.permute.xlu0 %522 }
  0x9c   : > { %v518_v50 = vpop.permute.xlu1 %517 }
  0xa0   : > { %v528_v18 = vpop.permute.xlu1 %527 }
 0x128   : > { %v750_v25 = vpop.f32.mrb[0].mxu0 }
 0x129   : > { %v751_v26 = vadd.f32 %v750_v25, %v503_v22  ;;  %v851_v27 = vpop.f32.mrb[0].mxu1  ;;  %v752_v28 = vpop.f32.mrb[1].mxu0 }
 0x12a   : > { %v852_v29 = vadd.f32 %v851_v27, %v503_v22  ;;  %v753_v30 = vadd.f32 %v752_v28, %v503_v22  ;;  %v853_v31 = vpop.f32.mrb[1].mxu1  ;;  %v754_v32 = vpop.f32.mrb[2].mxu0 }
 0x12b   : > { %v854_v33 = vadd.f32 %v853_v31, %v503_v22  ;;  %v755_v34 = vadd.f32 %v754_v32, %v508_v23  ;;  %v855_v35 = vpop.f32.mrb[2].mxu1  ;;  %v756_v36 = vpop.f32.mrb[3].mxu0  ;;  %v918_v40 = vmax.f32 %v751_v26, 0.0 }
 0x12c   : > { %v856_v37 = vadd.f32 %v855_v35, %v508_v23  ;;  %v757_v38 = vadd.f32 %v756_v36, %v508_v23  ;;  %v857_v39 = vpop.f32.mrb[3].mxu1  ;;  %v920_v43 = vmax.f32 %v852_v29, 0.0  ;;  %v919_v44 = vmax.f32 %v753_v30, 0.0 }
 0x12d   : > { %v922_v41 = vmax.f32 %v755_v34, 0.0  ;;  %v858_v42 = vadd.f32 %v857_v39, %v508_v23  ;;  %v921_v47 = vmax.f32 %v854_v33, 0.0 }
 0x12e   : > { %v924_v45 = vmax.f32 %v856_v37, 0.0  ;;  %v923_v46 = vmax.f32 %v757_v38, 0.0 }
 0x12f   : > { %v970_v48 = vpack.c.bf16 %v922_v41, %v918_v40  ;;  %v925_v49 = vmax.f32 %v858_v42, 0.0 }
 0x130   : > { %v972_v51 = vpack.c.bf16 %v924_v45, %v920_v43  ;;  %v971_v52 = vpack.c.bf16 %v923_v46, %v919_v44  ;;  %v760_v53 = vpop.f32.mrb[4].mxu0  ;;  %v533_v43 = vpop.permute.xlu0 %532 }
 0x131   : > { %v973_v54 = vpack.c.bf16 %v925_v49, %v921_v47  ;;  %v761_v55 = vadd.f32 %v760_v53, %v513_v24  ;;  %v861_v56 = vpop.f32.mrb[4].mxu1  ;;  %v762_v57 = vpop.f32.mrb[5].mxu0 }
 0x132   : > { %v862_v58 = vadd.f32 %v861_v56, %v513_v24  ;;  %v763_v59 = vadd.f32 %v762_v57, %v513_v24  ;;  %v863_v60 = vpop.f32.mrb[5].mxu1  ;;  %v764_v61 = vpop.f32.mrb[6].mxu0  ;;  %1157 = vmatprep.subr.bf16.mxu0 %v971_v52 }
 0x133   : > { %v864_v62 = vadd.f32 %v863_v60, %v513_v24  ;;  %v765_v63 = vadd.f32 %v764_v61, %v518_v50  ;;  %v865_v2 = vpop.f32.mrb[6].mxu1  ;;  %1258 = vmatprep.subr.bf16.mxu1 %v973_v54  ;;  %v766_v3 = vpop.f32.mrb[7].mxu0  ;;  %1158 = vmatpush1.bf16.msra.mxu0 %v970_v48  ;;  %v926_v7 = vmax.f32 %v761_v55, 0.0 }
 0x134   : > { %v866_v4 = vadd.f32 %v865_v2, %v518_v50  ;;  %v767_v5 = vadd.f32 %v766_v3, %v518_v50  ;;  %v867_v6 = vpop.f32.mrb[7].mxu1  ;;  %1259 = vmatpush1.bf16.msra.mxu1 %v972_v51  ;;  %v928_v10 = vmax.f32 %v862_v58, 0.0  ;;  %v927_v11 = vmax.f32 %v763_v59, 0.0  ;;  %v538_v47 = vpop.permute.xlu1 %537 }
 0x135   : > { %v930_v8 = vmax.f32 %v765_v63, 0.0  ;;  %v868_v9 = vadd.f32 %v867_v6, %v518_v50  ;;  %v929_v15 = vmax.f32 %v864_v62, 0.0 }
 0x136   : > { %v932_v12 = vmax.f32 %v866_v4, 0.0  ;;  %v931_v13 = vmax.f32 %v767_v5, 0.0 }
 0x137   : > { %v974_v16 = vpack.c.bf16 %v930_v8, %v926_v7  ;;  %v933_v17 = vmax.f32 %v868_v9, 0.0 }
 0x138   : > { %v976_v0 = vpack.c.bf16 %v932_v12, %v928_v10  ;;  %v975_v19 = vpack.c.bf16 %v931_v13, %v927_v11  ;;  %v770_v20 = vpop.f32.mrb[8].mxu0  ;;  %v543_v11 = vpop.permute.xlu0 %542 }
 0x139   : > { %v977_v21 = vpack.c.bf16 %v933_v17, %v929_v15  ;;  %v771_v22 = vadd.f32 %v770_v20, %v523_v14  ;;  %v871_v23 = vpop.f32.mrb[8].mxu1  ;;  %v772_v24 = vpop.f32.mrb[9].mxu0 }
 0x13a   : > { %v872_v25 = vadd.f32 %v871_v23, %v523_v14  ;;  %v773_v26 = vadd.f32 %v772_v24, %v523_v14  ;;  %v873_v27 = vpop.f32.mrb[9].mxu1  ;;  %v774_v28 = vpop.f32.mrb[10].mxu0  ;;  %1159 = vmatprep.subr.bf16.mxu0 %v975_v19 }
 0x13b   : > { %v874_v29 = vadd.f32 %v873_v27, %v523_v14  ;;  %v775_v30 = vadd.f32 %v774_v28, %v528_v18  ;;  %v875_v31 = vpop.f32.mrb[10].mxu1  ;;  %1260 = vmatprep.subr.bf16.mxu1 %v977_v21  ;;  %v776_v32 = vpop.f32.mrb[11].mxu0  ;;  %1160 = vmatpush1.bf16.msra.mxu0 %v974_v16  ;;  %v934_v36 = vmax.f32 %v771_v22, 0.0 }
 0x13c   : > { %v876_v33 = vadd.f32 %v875_v31, %v528_v18  ;;  %v777_v34 = vadd.f32 %v776_v32, %v528_v18  ;;  %v877_v35 = vpop.f32.mrb[11].mxu1  ;;  %1261 = vmatpush1.bf16.msra.mxu1 %v976_v0  ;;  %v936_v39 = vmax.f32 %v872_v25, 0.0  ;;  %v935_v40 = vmax.f32 %v773_v26, 0.0  ;;  %v548_v15 = vpop.permute.xlu1 %547 }
 0x13d   : > { %v938_v37 = vmax.f32 %v775_v30, 0.0  ;;  %v878_v38 = vadd.f32 %v877_v35, %v528_v18  ;;  %v937_v44 = vmax.f32 %v874_v29, 0.0 }
 0x13e   : > { %v940_v41 = vmax.f32 %v876_v33, 0.0  ;;  %v939_v42 = vmax.f32 %v777_v34, 0.0 }
 0x13f   : > { %v978_v45 = vpack.c.bf16 %v938_v37, %v934_v36  ;;  %v941_v46 = vmax.f32 %v878_v38, 0.0 }
 0x140   : > { %v980_v48 = vpack.c.bf16 %v940_v41, %v936_v39  ;;  %v979_v49 = vpack.c.bf16 %v939_v42, %v935_v40  ;;  %v780_v50 = vpop.f32.mrb[12].mxu0  ;;  %v553_v40 = vpop.permute.xlu0 %552 }
 0x141   : > { %v981_v51 = vpack.c.bf16 %v941_v46, %v937_v44  ;;  %v781_v52 = vadd.f32 %v780_v50, %v533_v43  ;;  %v881_v53 = vpop.f32.mrb[12].mxu1  ;;  %v782_v54 = vpop.f32.mrb[13].mxu0 }
 0x142   : > { %v882_v55 = vadd.f32 %v881_v53, %v533_v43  ;;  %v783_v56 = vadd.f32 %v782_v54, %v533_v43  ;;  %v883_v57 = vpop.f32.mrb[13].mxu1  ;;  %v784_v58 = vpop.f32.mrb[14].mxu0  ;;  %1161 = vmatprep.subr.bf16.mxu0 %v979_v49 }
 0x143   : > { %v884_v59 = vadd.f32 %v883_v57, %v533_v43  ;;  %v785_v60 = vadd.f32 %v784_v58, %v538_v47  ;;  %v885_v61 = vpop.f32.mrb[14].mxu1  ;;  %1262 = vmatprep.subr.bf16.mxu1 %v981_v51  ;;  %v786_v62 = vpop.f32.mrb[15].mxu0  ;;  %1162 = vmatpush1.bf16.msra.mxu0 %v978_v45  ;;  %v942_v4 = vmax.f32 %v781_v52, 0.0 }
 0x144   : > { %v886_v63 = vadd.f32 %v885_v61, %v538_v47  ;;  %v787_v2 = vadd.f32 %v786_v62, %v538_v47  ;;  %v887_v3 = vpop.f32.mrb[15].mxu1  ;;  %1263 = vmatpush1.bf16.msra.mxu1 %v980_v48  ;;  %v944_v7 = vmax.f32 %v882_v55, 0.0  ;;  %v943_v8 = vmax.f32 %v783_v56, 0.0  ;;  %v558_v44 = vpop.permute.xlu1 %557 }
 0x145   : > { %v946_v5 = vmax.f32 %v785_v60, 0.0  ;;  %v888_v6 = vadd.f32 %v887_v3, %v538_v47  ;;  %v945_v12 = vmax.f32 %v884_v59, 0.0 }
 0x146   : > { %v948_v9 = vmax.f32 %v886_v63, 0.0  ;;  %v947_v10 = vmax.f32 %v787_v2, 0.0 }
 0x147   : > { %v982_v13 = vpack.c.bf16 %v946_v5, %v942_v4  ;;  %v949_v14 = vmax.f32 %v888_v6, 0.0 }
 0x148   : > { %v984_v16 = vpack.c.bf16 %v948_v9, %v944_v7  ;;  %v983_v17 = vpack.c.bf16 %v947_v10, %v943_v8  ;;  %v790_v18 = vpop.f32.mrb[16].mxu0 }
 0x149   : > { %v985_v0 = vpack.c.bf16 %v949_v14, %v945_v12  ;;  %v791_v19 = vadd.f32 %v790_v18, %v543_v11  ;;  %v891_v20 = vpop.f32.mrb[16].mxu1  ;;  %v792_v21 = vpop.f32.mrb[17].mxu0 }
 0x14a   : > { %v892_v22 = vadd.f32 %v891_v20, %v543_v11  ;;  %v793_v23 = vadd.f32 %v792_v21, %v543_v11  ;;  %v893_v24 = vpop.f32.mrb[17].mxu1  ;;  %v794_v25 = vpop.f32.mrb[18].mxu0  ;;  %1163 = vmatprep.subr.bf16.mxu0 %v983_v17 }
 0x14b   : > { %v894_v26 = vadd.f32 %v893_v24, %v543_v11  ;;  %v795_v27 = vadd.f32 %v794_v25, %v548_v15  ;;  %v895_v28 = vpop.f32.mrb[18].mxu1  ;;  %1264 = vmatprep.subr.bf16.mxu1 %v985_v0  ;;  %v796_v29 = vpop.f32.mrb[19].mxu0  ;;  %1164 = vmatpush1.bf16.msra.mxu0 %v982_v13  ;;  %v950_v33 = vmax.f32 %v791_v19, 0.0 }
 0x14c   : > { %v896_v30 = vadd.f32 %v895_v28, %v548_v15  ;;  %v797_v31 = vadd.f32 %v796_v29, %v548_v15  ;;  %v897_v32 = vpop.f32.mrb[19].mxu1  ;;  %1265 = vmatpush1.bf16.msra.mxu1 %v984_v16  ;;  %v952_v36 = vmax.f32 %v892_v22, 0.0  ;;  %v951_v37 = vmax.f32 %v793_v23, 0.0  ;;  %v563_v11 = vpop.permute.xlu0 %562 }
 0x14d   : > { %v954_v34 = vmax.f32 %v795_v27, 0.0  ;;  %v898_v35 = vadd.f32 %v897_v32, %v548_v15  ;;  %v953_v41 = vmax.f32 %v894_v26, 0.0 }
 0x14e   : > { %v956_v38 = vmax.f32 %v896_v30, 0.0  ;;  %v955_v39 = vmax.f32 %v797_v31, 0.0 }
 0x14f   : > { %v986_v42 = vpack.c.bf16 %v954_v34, %v950_v33  ;;  %v957_v43 = vmax.f32 %v898_v35, 0.0 }
 0x150   : > { %v988_v45 = vpack.c.bf16 %v956_v38, %v952_v36  ;;  %v987_v46 = vpack.c.bf16 %v955_v39, %v951_v37  ;;  %v800_v47 = vpop.f32.mrb[20].mxu0  ;;  %v1886_v36 = vld [vmem:[%s2346_s3] sm:$0xff]   ;;  %v1887_v37 = vld [vmem:[%s2346_s3 + $0x8] sm:$0xff]   ;;  %v1888_v38 = vld [vmem:[%s2346_s3 + $0x10] sm:$0xff]  }
 0x151   : > { %v989_v48 = vpack.c.bf16 %v957_v43, %v953_v41  ;;  %v801_v49 = vadd.f32 %v800_v47, %v553_v40  ;;  %v901_v50 = vpop.f32.mrb[20].mxu1  ;;  %v802_v51 = vpop.f32.mrb[21].mxu0  ;;  %v1889_v39 = vld [vmem:[%s2346_s3 + $0x18] sm:$0xff]   ;;  %v1891_v41 = vld [vmem:[%s2346_s3 + $0x28] sm:$0xff]  }
 0x152   : > { %v902_v52 = vadd.f32 %v901_v50, %v553_v40  ;;  %v803_v53 = vadd.f32 %v802_v51, %v553_v40  ;;  %v903_v54 = vpop.f32.mrb[21].mxu1  ;;  %v804_v55 = vpop.f32.mrb[22].mxu0  ;;  %1165 = vmatprep.subr.bf16.mxu0 %v987_v46 }
 0x153   : > { %v904_v56 = vadd.f32 %v903_v54, %v553_v40  ;;  %v805_v57 = vadd.f32 %v804_v55, %v558_v44  ;;  %v905_v58 = vpop.f32.mrb[22].mxu1  ;;  %1266 = vmatprep.subr.bf16.mxu1 %v989_v48  ;;  %v806_v59 = vpop.f32.mrb[23].mxu0  ;;  %1166 = vmatpush1.bf16.msra.mxu0 %v986_v42  ;;  %v958_v63 = vmax.f32 %v801_v49, 0.0  ;;  %v1890_v40 = vld [vmem:[%s2346_s3 + $0x20] sm:$0xff]  }
 0x154   : > { %v906_v60 = vadd.f32 %v905_v58, %v558_v44  ;;  %v807_v61 = vadd.f32 %v806_v59, %v558_v44  ;;  %v907_v62 = vpop.f32.mrb[23].mxu1  ;;  %1267 = vmatpush1.bf16.msra.mxu1 %v988_v45  ;;  %v960_v4 = vmax.f32 %v902_v52, 0.0  ;;  %v959_v5 = vmax.f32 %v803_v53, 0.0  ;;  %v1892_v42 = vld [vmem:[%s2346_s3 + $0x30] ss:$0 sps:$4 sm:$0x33]   ;;  %v1032_v43 = vpop.permute.xlu0 %1031 }
 0x155   : > { %v962_v2 = vmax.f32 %v805_v57, 0.0  ;;  %v908_v3 = vadd.f32 %v907_v62, %v558_v44  ;;  %v961_v8 = vmax.f32 %v904_v56, 0.0  ;;  %v1027_v44 = vpop.permute.xlu1 %1026 }
 0x156   : > { %v964_v6 = vmax.f32 %v906_v60, 0.0  ;;  %v963_v7 = vmax.f32 %v807_v61, 0.0 }
 0x157   : > { %v990_v9 = vpack.c.bf16 %v962_v2, %v958_v63  ;;  %v965_v10 = vmax.f32 %v908_v3, 0.0 }
 0x158   : > { %v992_v12 = vpack.c.bf16 %v964_v6, %v960_v4  ;;  %v991_v13 = vpack.c.bf16 %v963_v7, %v959_v5  ;;  %v810_v14 = vpop.f32.mrb[24].mxu0  ;;  %v1042_v4 = vpop.permute.xlu0 %1041 }
 0x159   : > { %v993_v15 = vpack.c.bf16 %v965_v10, %v961_v8  ;;  %v811_v16 = vadd.f32 %v810_v14, %v563_v11  ;;  %v911_v17 = vpop.f32.mrb[24].mxu1  ;;  %v812_v18 = vpop.f32.mrb[25].mxu0 }
 0x15a   : > { %v912_v0 = vadd.f32 %v911_v17, %v563_v11  ;;  %v813_v19 = vadd.f32 %v812_v18, %v563_v11  ;;  %v913_v20 = vpop.f32.mrb[25].mxu1  ;;  %v814_v21 = vpop.f32.mrb[26].mxu0  ;;  %1167 = vmatprep.subr.bf16.mxu0 %v991_v13 }
 0x15b   : > { %v966_v22 = vmax.f32 %v811_v16, 0.0  ;;  %v914_v23 = vadd.f32 %v913_v20, %v563_v11  ;;  %v915_v24 = vpop.f32.mrb[26].mxu1  ;;  %1268 = vmatprep.subr.bf16.mxu1 %v993_v15  ;;  %v815_v25 = vpop.f32.mrb[27].mxu0  ;;  %1168 = vmatpush1.bf16.msra.mxu0 %v990_v9 }
 0x15c   : > { %v968_v26 = vmax.f32 %v912_v0, 0.0  ;;  %v967_v27 = vmax.f32 %v813_v19, 0.0  ;;  %v916_v28 = vpop.f32.mrb[27].mxu1  ;;  %1269 = vmatpush1.bf16.msra.mxu1 %v992_v12  ;;  %v1037_v8 = vpop.permute.xlu1 %1036 }
 0x15d   : > { %v994_v29 = vpack.c.bf16 %v966_v22, %v966_v22  ;;  %v969_v30 = vmax.f32 %v914_v23, 0.0 }
 0x15e   : > { %v996_v31 = vpack.c.bf16 %v968_v26, %v968_v26  ;;  %v995_v32 = vpack.c.bf16 %v967_v27, %v967_v27 }
 0x15f   : > { %v997_v33 = vpack.c.bf16 %v969_v30, %v969_v30  ;;  %v1146_v34 = vsel %vm1144_vm1, %v994_v29, 0 }
 0x160   : > { %1769 = vmatprep.subr.msk.bf16.mxu0 %vm1144_vm1, %v995_v32  ;;  %v1152_v35 = vsel %vm1144_vm1, %v996_v31, 0 }
 0x161   : > { %1777 = vmatprep.subr.msk.bf16.mxu1 %vm1144_vm1, %v997_v33  ;;  %1170 = vmatpush1.bf16.msra.mxu0 %v1146_v34  ;;  %v1052_v33 = vpop.permute.xlu0 %1051 }
 0x162   : > { %1271 = vmatpush1.bf16.msra.mxu1 %v1152_v35 }
 0x164   : > { %1770 = vmatmul.mubr.msk.bf16.vlgmr.msra.gmra.mrb[28].mxu0 %vm1122_vm2, %v1886_v36 }
 0x165   : > { %1778 = vmatmul.mubr.msk.bf16.vlgmr.msra.gmra.mrb[28].mxu1 %vm1122_vm2, %v1886_v36  ;;  %1199 = vmatprep.mubr.bf16.mxu0 %v1909_v1 }
 0x166   : > { %1300 = vmatprep.mubr.bf16.mxu1 %v1909_v1 }
 0x16c   : > { %1771 = vmatmul.mubr.msk.bf16.gmra.mrb[32].mxu0 %vm1122_vm2, %v1887_v37 }
 0x16d   : > { %1779 = vmatmul.mubr.msk.bf16.gmra.mrb[32].mxu1 %vm1122_vm2, %v1887_v37  ;;  %1209 = vmatprep.mubr.bf16.mxu0 %v1909_v1  ;;  %v1047_v37 = vpop.permute.xlu1 %1046 }
 0x16e   : > { %1310 = vmatprep.mubr.bf16.mxu1 %v1909_v1 }
 0x174   : > { %1772 = vmatmul.mubr.msk.bf16.gmra.mrb[36].mxu0 %vm1122_vm2, %v1888_v38 }
 0x175   : > { %1780 = vmatmul.mubr.msk.bf16.gmra.mrb[36].mxu1 %vm1122_vm2, %v1888_v38  ;;  %1219 = vmatprep.mubr.bf16.mxu0 %v1909_v1 }
 0x176   : > { %1320 = vmatprep.mubr.bf16.mxu1 %v1909_v1 }
 0x17c   : > { %1773 = vmatmul.mubr.msk.bf16.gmra.mrb[40].mxu0 %vm1122_vm2, %v1889_v39 }
 0x17d   : > { %1781 = vmatmul.mubr.msk.bf16.gmra.mrb[40].mxu1 %vm1122_vm2, %v1889_v39  ;;  %1229 = vmatprep.mubr.bf16.mxu0 %v1909_v1 }
 0x17e   : > { %1330 = vmatprep.mubr.bf16.mxu1 %v1909_v1 }
 0x184   : > { %1774 = vmatmul.mubr.msk.bf16.gmra.mrb[44].mxu0 %vm1122_vm2, %v1890_v40 }
 0x185   : > { %1782 = vmatmul.mubr.msk.bf16.gmra.mrb[44].mxu1 %vm1122_vm2, %v1890_v40  ;;  %1239 = vmatprep.mubr.bf16.mxu0 %v1909_v1 }
 0x186   : > { %1340 = vmatprep.mubr.bf16.mxu1 %v1909_v1 }
 0x18c   : > { %1775 = vmatmul.mubr.msk.bf16.gmra.mrb[48].mxu0 %vm1122_vm2, %v1891_v41 }
 0x18d   : > { %1783 = vmatmul.mubr.msk.bf16.gmra.mrb[48].mxu1 %vm1122_vm2, %v1891_v41  ;;  %1249 = vmatprep.mubr.bf16.mxu0 %v1909_v1 }
 0x18e   : > { %1350 = vmatprep.mubr.bf16.mxu1 %v1909_v1 }
 0x194   : > { %1776 = vmatmul.mubr.msk.bf16.gmra.mrb[52].mxu0 %vm1122_vm2, %v1892_v42 }
 0x195   : > { %1784 = vmatmul.mubr.msk.bf16.gmra.mrb[52].mxu1 %vm1122_vm2, %v1892_v42  ;;  %1493 = vmatprep.mubr.bf16.mxu0 %v1909_v1 }
 0x196   : > { %1534 = vmatprep.mubr.bf16.mxu1 %v1909_v1 }
 0x237   : > { %v1191_v45 = vpop.f32.mrb[28].mxu0 }
 0x238   : > { %v1192_v46 = vadd.f32 %v1191_v45, %v1027_v44  ;;  %v1292_v47 = vpop.f32.mrb[28].mxu1  ;;  %v1193_v48 = vpop.f32.mrb[29].mxu0 }
 0x239   : > { %v1293_v49 = vadd.f32 %v1292_v47, %v1027_v44  ;;  %v1194_v50 = vadd.f32 %v1193_v48, %v1027_v44  ;;  %v1294_v51 = vpop.f32.mrb[29].mxu1  ;;  %v1195_v52 = vpop.f32.mrb[30].mxu0 }
 0x23a   : > { %v1295_v53 = vadd.f32 %v1294_v51, %v1027_v44  ;;  %v1196_v54 = vadd.f32 %v1195_v52, %v1032_v43  ;;  %v1296_v55 = vpop.f32.mrb[30].mxu1  ;;  %v1197_v56 = vpop.f32.mrb[31].mxu0  ;;  %v1359_v60 = vmax.f32 %v1192_v46, 0.0 }
 0x23b   : > { %v1297_v57 = vadd.f32 %v1296_v55, %v1032_v43  ;;  %v1198_v58 = vadd.f32 %v1197_v56, %v1032_v43  ;;  %v1298_v59 = vpop.f32.mrb[31].mxu1  ;;  %v1361_v62 = vmax.f32 %v1293_v49, 0.0  ;;  %v1360_v63 = vmax.f32 %v1194_v50, 0.0 }
 0x23c   : > { %v1363_v61 = vmax.f32 %v1196_v54, 0.0  ;;  %v1299_v1 = vadd.f32 %v1298_v59, %v1032_v43  ;;  %v1362_v5 = vmax.f32 %v1295_v53, 0.0 }
 0x23d   : > { %v1365_v2 = vmax.f32 %v1297_v57, 0.0  ;;  %v1364_v3 = vmax.f32 %v1198_v58, 0.0 }
 0x23e   : > { %v1411_v6 = vpack.c.bf16 %v1363_v61, %v1359_v60  ;;  %v1366_v7 = vmax.f32 %v1299_v1, 0.0 }
 0x23f   : > { %v1413_v9 = vpack.c.bf16 %v1365_v2, %v1361_v62  ;;  %v1412_v10 = vpack.c.bf16 %v1364_v3, %v1360_v63  ;;  %v1201_v11 = vpop.f32.mrb[32].mxu0  ;;  %v1062_v62 = vpop.permute.xlu0 %1061 }
 0x240   : > { %v1414_v12 = vpack.c.bf16 %v1366_v7, %v1362_v5  ;;  %v1202_v13 = vadd.f32 %v1201_v11, %v1037_v8  ;;  %v1302_v14 = vpop.f32.mrb[32].mxu1  ;;  %v1203_v15 = vpop.f32.mrb[33].mxu0 }
 0x241   : > { %v1303_v16 = vadd.f32 %v1302_v14, %v1037_v8  ;;  %v1204_v17 = vadd.f32 %v1203_v15, %v1037_v8  ;;  %v1304_v18 = vpop.f32.mrb[33].mxu1  ;;  %v1205_v0 = vpop.f32.mrb[34].mxu0  ;;  %1461 = vmatprep.subr.bf16.mxu0 %v1412_v10 }
 0x242   : > { %v1305_v19 = vadd.f32 %v1304_v18, %v1037_v8  ;;  %v1206_v20 = vadd.f32 %v1205_v0, %v1042_v4  ;;  %v1306_v21 = vpop.f32.mrb[34].mxu1  ;;  %1502 = vmatprep.subr.bf16.mxu1 %v1414_v12  ;;  %v1207_v22 = vpop.f32.mrb[35].mxu0  ;;  %1462 = vmatpush1.bf16.msra.mxu0 %v1411_v6  ;;  %v1367_v26 = vmax.f32 %v1202_v13, 0.0 }
 0x243   : > { %v1307_v23 = vadd.f32 %v1306_v21, %v1042_v4  ;;  %v1208_v24 = vadd.f32 %v1207_v22, %v1042_v4  ;;  %v1308_v25 = vpop.f32.mrb[35].mxu1  ;;  %1503 = vmatpush1.bf16.msra.mxu1 %v1413_v9  ;;  %v1369_v29 = vmax.f32 %v1303_v16, 0.0  ;;  %v1368_v30 = vmax.f32 %v1204_v17, 0.0 }
 0x244   : > { %v1371_v27 = vmax.f32 %v1206_v20, 0.0  ;;  %v1309_v28 = vadd.f32 %v1308_v25, %v1042_v4  ;;  %v1370_v34 = vmax.f32 %v1305_v19, 0.0  ;;  %v1057_v4 = vpop.permute.xlu1 %1056 }
 0x245   : > { %v1373_v31 = vmax.f32 %v1307_v23, 0.0  ;;  %v1372_v32 = vmax.f32 %v1208_v24, 0.0 }
 0x246   : > { %v1415_v35 = vpack.c.bf16 %v1371_v27, %v1367_v26  ;;  %v1374_v36 = vmax.f32 %v1309_v28, 0.0 }
 0x247   : > { %v1417_v38 = vpack.c.bf16 %v1373_v31, %v1369_v29  ;;  %v1416_v39 = vpack.c.bf16 %v1372_v32, %v1368_v30  ;;  %v1211_v40 = vpop.f32.mrb[36].mxu0  ;;  %v1072_v29 = vpop.permute.xlu0 %1071 }
 0x248   : > { %v1418_v41 = vpack.c.bf16 %v1374_v36, %v1370_v34  ;;  %v1212_v42 = vadd.f32 %v1211_v40, %v1047_v37  ;;  %v1312_v43 = vpop.f32.mrb[36].mxu1  ;;  %v1213_v44 = vpop.f32.mrb[37].mxu0 }
 0x249   : > { %v1313_v45 = vadd.f32 %v1312_v43, %v1047_v37  ;;  %v1214_v46 = vadd.f32 %v1213_v44, %v1047_v37  ;;  %v1314_v47 = vpop.f32.mrb[37].mxu1  ;;  %v1215_v48 = vpop.f32.mrb[38].mxu0  ;;  %1463 = vmatprep.subr.bf16.mxu0 %v1416_v39 }
 0x24a   : > { %v1315_v49 = vadd.f32 %v1314_v47, %v1047_v37  ;;  %v1216_v50 = vadd.f32 %v1215_v48, %v1052_v33  ;;  %v1316_v51 = vpop.f32.mrb[38].mxu1  ;;  %1504 = vmatprep.subr.bf16.mxu1 %v1418_v41  ;;  %v1217_v52 = vpop.f32.mrb[39].mxu0  ;;  %1464 = vmatpush1.bf16.msra.mxu0 %v1415_v35  ;;  %v1375_v56 = vmax.f32 %v1212_v42, 0.0 }
 0x24b   : > { %v1317_v53 = vadd.f32 %v1316_v51, %v1052_v33  ;;  %v1218_v54 = vadd.f32 %v1217_v52, %v1052_v33  ;;  %v1318_v55 = vpop.f32.mrb[39].mxu1  ;;  %1505 = vmatpush1.bf16.msra.mxu1 %v1417_v38  ;;  %v1377_v59 = vmax.f32 %v1313_v45, 0.0  ;;  %v1376_v60 = vmax.f32 %v1214_v46, 0.0 }
 0x24c   : > { %v1379_v57 = vmax.f32 %v1216_v50, 0.0  ;;  %v1319_v58 = vadd.f32 %v1318_v55, %v1052_v33  ;;  %v1378_v63 = vmax.f32 %v1315_v49, 0.0  ;;  %v1067_v33 = vpop.permute.xlu1 %1066 }
 0x24d   : > { %v1381_v61 = vmax.f32 %v1317_v53, 0.0  ;;  %v1380_v1 = vmax.f32 %v1218_v54, 0.0 }
 0x24e   : > { %v1419_v2 = vpack.c.bf16 %v1379_v57, %v1375_v56  ;;  %v1382_v3 = vmax.f32 %v1319_v58, 0.0 }
 0x24f   : > { %v1421_v5 = vpack.c.bf16 %v1381_v61, %v1377_v59  ;;  %v1420_v6 = vpack.c.bf16 %v1380_v1, %v1376_v60  ;;  %v1221_v7 = vpop.f32.mrb[40].mxu0  ;;  %v1082_v59 = vpop.permute.xlu0 %1081 }
 0x250   : > { %v1422_v8 = vpack.c.bf16 %v1382_v3, %v1378_v63  ;;  %v1222_v9 = vadd.f32 %v1221_v7, %v1057_v4  ;;  %v1322_v10 = vpop.f32.mrb[40].mxu1  ;;  %v1223_v11 = vpop.f32.mrb[41].mxu0 }
 0x251   : > { %v1323_v12 = vadd.f32 %v1322_v10, %v1057_v4  ;;  %v1224_v13 = vadd.f32 %v1223_v11, %v1057_v4  ;;  %v1324_v14 = vpop.f32.mrb[41].mxu1  ;;  %v1225_v15 = vpop.f32.mrb[42].mxu0  ;;  %1465 = vmatprep.subr.bf16.mxu0 %v1420_v6 }
 0x252   : > { %v1325_v16 = vadd.f32 %v1324_v14, %v1057_v4  ;;  %v1226_v17 = vadd.f32 %v1225_v15, %v1062_v62  ;;  %v1326_v18 = vpop.f32.mrb[42].mxu1  ;;  %1506 = vmatprep.subr.bf16.mxu1 %v1422_v8  ;;  %v1227_v0 = vpop.f32.mrb[43].mxu0  ;;  %1466 = vmatpush1.bf16.msra.mxu0 %v1419_v2  ;;  %v1383_v22 = vmax.f32 %v1222_v9, 0.0 }
 0x253   : > { %v1327_v19 = vadd.f32 %v1326_v18, %v1062_v62  ;;  %v1228_v20 = vadd.f32 %v1227_v0, %v1062_v62  ;;  %v1328_v21 = vpop.f32.mrb[43].mxu1  ;;  %1507 = vmatpush1.bf16.msra.mxu1 %v1421_v5  ;;  %v1385_v25 = vmax.f32 %v1323_v12, 0.0  ;;  %v1384_v26 = vmax.f32 %v1224_v13, 0.0 }
 0x254   : > { %v1387_v23 = vmax.f32 %v1226_v17, 0.0  ;;  %v1329_v24 = vadd.f32 %v1328_v21, %v1062_v62  ;;  %v1386_v30 = vmax.f32 %v1325_v16, 0.0  ;;  %v1077_v62 = vpop.permute.xlu1 %1076 }
 0x255   : > { %v1389_v27 = vmax.f32 %v1327_v19, 0.0  ;;  %v1388_v28 = vmax.f32 %v1228_v20, 0.0 }
 0x256   : > { %v1423_v31 = vpack.c.bf16 %v1387_v23, %v1383_v22  ;;  %v1390_v32 = vmax.f32 %v1329_v24, 0.0 }
 0x257   : > { %v1425_v34 = vpack.c.bf16 %v1389_v27, %v1385_v25  ;;  %v1424_v35 = vpack.c.bf16 %v1388_v28, %v1384_v26  ;;  %v1231_v36 = vpop.f32.mrb[44].mxu0 }
 0x258   : > { %v1426_v37 = vpack.c.bf16 %v1390_v32, %v1386_v30  ;;  %v1232_v38 = vadd.f32 %v1231_v36, %v1067_v33  ;;  %v1332_v39 = vpop.f32.mrb[44].mxu1  ;;  %v1233_v40 = vpop.f32.mrb[45].mxu0 }
 0x259   : > { %v1333_v41 = vadd.f32 %v1332_v39, %v1067_v33  ;;  %v1234_v42 = vadd.f32 %v1233_v40, %v1067_v33  ;;  %v1334_v43 = vpop.f32.mrb[45].mxu1  ;;  %v1235_v44 = vpop.f32.mrb[46].mxu0  ;;  %1467 = vmatprep.subr.bf16.mxu0 %v1424_v35 }
 0x25a   : > { %v1335_v45 = vadd.f32 %v1334_v43, %v1067_v33  ;;  %v1236_v46 = vadd.f32 %v1235_v44, %v1072_v29  ;;  %v1336_v47 = vpop.f32.mrb[46].mxu1  ;;  %1508 = vmatprep.subr.bf16.mxu1 %v1426_v37  ;;  %v1237_v48 = vpop.f32.mrb[47].mxu0  ;;  %1468 = vmatpush1.bf16.msra.mxu0 %v1423_v31  ;;  %v1391_v52 = vmax.f32 %v1232_v38, 0.0 }
 0x25b   : > { %v1337_v49 = vadd.f32 %v1336_v47, %v1072_v29  ;;  %v1238_v50 = vadd.f32 %v1237_v48, %v1072_v29  ;;  %v1338_v51 = vpop.f32.mrb[47].mxu1  ;;  %1509 = vmatpush1.bf16.msra.mxu1 %v1425_v34  ;;  %v1393_v55 = vmax.f32 %v1333_v41, 0.0  ;;  %v1392_v56 = vmax.f32 %v1234_v42, 0.0  ;;  %v1087_v28 = vpop.permute.xlu1 %1086 }
 0x25c   : > { %v1395_v53 = vmax.f32 %v1236_v46, 0.0  ;;  %v1339_v54 = vadd.f32 %v1338_v51, %v1072_v29  ;;  %v1394_v60 = vmax.f32 %v1335_v45, 0.0 }
 0x25d   : > { %v1397_v57 = vmax.f32 %v1337_v49, 0.0  ;;  %v1396_v58 = vmax.f32 %v1238_v50, 0.0 }
 0x25e   : > { %v1427_v61 = vpack.c.bf16 %v1395_v53, %v1391_v52  ;;  %v1398_v1 = vmax.f32 %v1339_v54, 0.0  ;;  %v1439_v54 = vld [vmem:[%s2348_s5] sm:$0x7] }
 0x25f   : > { %v1429_v63 = vpack.c.bf16 %v1397_v57, %v1393_v55  ;;  %v1428_v2 = vpack.c.bf16 %v1396_v58, %v1392_v56  ;;  %v1241_v3 = vpop.f32.mrb[48].mxu0  ;;  %v1547_v55 = vlaneseq  ;;  %v1553_v58 = vstv %s1789_s26 }
 0x260   : > { %v1430_v4 = vpack.c.bf16 %v1398_v1, %v1394_v60  ;;  %v1242_v5 = vadd.f32 %v1241_v3, %v1077_v62  ;;  %v1342_v6 = vpop.f32.mrb[48].mxu1  ;;  %v1243_v7 = vpop.f32.mrb[49].mxu0 }
 0x261   : > { %v1343_v8 = vadd.f32 %v1342_v6, %v1077_v62  ;;  %v1244_v9 = vadd.f32 %v1243_v7, %v1077_v62  ;;  %v1344_v10 = vpop.f32.mrb[49].mxu1  ;;  %v1245_v11 = vpop.f32.mrb[50].mxu0  ;;  %1469 = vmatprep.subr.bf16.mxu0 %v1428_v2  ;;  %v1548_v56 = vand.u32 127, %v1547_v55 }
 0x262   : > { %v1345_v12 = vadd.f32 %v1344_v10, %v1077_v62  ;;  %v1246_v13 = vadd.f32 %v1245_v11, %v1082_v59  ;;  %v1346_v14 = vpop.f32.mrb[50].mxu1  ;;  %1510 = vmatprep.subr.bf16.mxu1 %v1430_v4  ;;  %v1247_v15 = vpop.f32.mrb[51].mxu0  ;;  %1470 = vmatpush1.bf16.msra.mxu0 %v1427_v61  ;;  %v1399_v0 = vmax.f32 %v1242_v5, 0.0 }
 0x263   : > { %v1347_v16 = vadd.f32 %v1346_v14, %v1082_v59  ;;  %v1248_v17 = vadd.f32 %v1247_v15, %v1082_v59  ;;  %v1348_v18 = vpop.f32.mrb[51].mxu1  ;;  %1511 = vmatpush1.bf16.msra.mxu1 %v1429_v63  ;;  %v1401_v21 = vmax.f32 %v1343_v8, 0.0  ;;  %v1400_v22 = vmax.f32 %v1244_v9, 0.0  ;;  %v1444_v63 = vpop.permute.xlu0 %1443 }
 0x264   : > { %v1403_v19 = vmax.f32 %v1246_v13, 0.0  ;;  %v1349_v20 = vadd.f32 %v1348_v18, %v1082_v59  ;;  %v1402_v25 = vmax.f32 %v1345_v12, 0.0  ;;  %v1550_v57 = vadd.s32 256, %v1548_v56 }
 0x265   : > { %v1405_v23 = vmax.f32 %v1347_v16, 0.0  ;;  %v1404_v24 = vmax.f32 %v1248_v17, 0.0  ;;  %v1549_v59 = vadd.s32 128, %v1548_v56  ;;  %v1551_v60 = vadd.s32 384, %v1548_v56 }
 0x266   : > { %v1431_v26 = vpack.c.bf16 %v1403_v19, %v1399_v0  ;;  %v1406_v27 = vmax.f32 %v1349_v20, 0.0  ;;  %v2276_v61 = vadd.s32 %v1553_v58, %v1548_v56  ;;  %v2278_v1 = vadd.s32 %v1553_v58, %v1550_v57 }
 0x267   : > { %v1433_v29 = vpack.c.bf16 %v1405_v23, %v1401_v21  ;;  %v1432_v30 = vpack.c.bf16 %v1404_v24, %v1400_v22  ;;  %v1251_v31 = vpop.f32.mrb[52].mxu0  ;;  %v2280_v62 = vadd.s32 %v1553_v58, %v1549_v59  ;;  %v2282_v3 = vadd.s32 %v1553_v58, %v1551_v60 }
 0x268   : > { %v1434_v32 = vpack.c.bf16 %v1406_v27, %v1402_v25  ;;  %v1252_v33 = vadd.f32 %v1251_v31, %v1087_v28  ;;  %v1352_v34 = vpop.f32.mrb[52].mxu1  ;;  %v1253_v35 = vpop.f32.mrb[53].mxu0  ;;  %vm1558_vm3 = vcmp.lt.s32.totalorder %v2276_v61, 600  ;;  %vm1560_vm4 = vcmp.lt.s32.totalorder %v2278_v1, 600 }
 0x269   : > { %v1353_v36 = vadd.f32 %v1352_v34, %v1087_v28  ;;  %v1254_v37 = vadd.f32 %v1253_v35, %v1087_v28  ;;  %v1354_v38 = vpop.f32.mrb[53].mxu1  ;;  %v1255_v39 = vpop.f32.mrb[54].mxu0  ;;  %1471 = vmatprep.subr.bf16.mxu0 %v1432_v30  ;;  %vm1559_vm6 = vcmp.lt.s32.totalorder %v2280_v62, 600  ;;  %vm1561_vm7 = vcmp.lt.s32.totalorder %v2282_v3, 600 }
 0x26a   : > { %v1407_v40 = vmax.f32 %v1252_v33, 0.0  ;;  %v1355_v41 = vadd.f32 %v1354_v38, %v1087_v28  ;;  %v1356_v42 = vpop.f32.mrb[54].mxu1  ;;  %1512 = vmatprep.subr.bf16.mxu1 %v1434_v32  ;;  %v1256_v43 = vpop.f32.mrb[55].mxu0  ;;  %1472 = vmatpush1.bf16.msra.mxu0 %v1431_v26 }
 0x26b   : > { %v1409_v44 = vmax.f32 %v1353_v36, 0.0  ;;  %v1408_v45 = vmax.f32 %v1254_v37, 0.0  ;;  %v1357_v46 = vpop.f32.mrb[55].mxu1  ;;  %1513 = vmatpush1.bf16.msra.mxu1 %v1433_v29 }
 0x26c   : > { %v1435_v47 = vpack.c.bf16 %v1407_v40, %v1407_v40  ;;  %v1410_v48 = vmax.f32 %v1355_v41, 0.0 }
 0x26d   : > { %v1437_v49 = vpack.c.bf16 %v1409_v44, %v1409_v44  ;;  %v1436_v50 = vpack.c.bf16 %v1408_v45, %v1408_v45 }
 0x26e   : > { %v1438_v51 = vpack.c.bf16 %v1410_v48, %v1410_v48  ;;  %v1450_v52 = vsel %vm1144_vm1, %v1435_v47, 0 }
 0x26f   : > { %1785 = vmatprep.subr.msk.bf16.mxu0 %vm1144_vm1, %v1436_v50  ;;  %v1456_v53 = vsel %vm1144_vm1, %v1437_v49, 0 }
 0x270   : > { %1787 = vmatprep.subr.msk.bf16.mxu1 %vm1144_vm1, %v1438_v51  ;;  %1474 = vmatpush1.bf16.msra.mxu0 %v1450_v52 }
 0x271   : > { %1515 = vmatpush1.bf16.msra.mxu1 %v1456_v53 }
 0x273   : > { %1786 = vmatmul.mubr.msk.bf16.vlgmr.msra.gmra.mrb[56].mxu0 %vm1122_vm2, %v1439_v54 }
 0x274   : > { %1788 = vmatmul.mubr.msk.bf16.vlgmr.msra.gmra.mrb[56].mxu1 %vm1122_vm2, %v1439_v54 }
 0x346   : > { %v1495_v2 = vpop.f32.mrb[56].mxu0 }
 0x347   : > { %v1496_v4 = vadd.f32 %v1495_v2, %v1444_v63  ;;  %v1536_v5 = vpop.f32.mrb[56].mxu1  ;;  %v1497_v6 = vpop.f32.mrb[57].mxu0 }
 0x348   : > { %v1537_v7 = vadd.f32 %v1536_v5, %v1444_v63  ;;  %v1498_v8 = vadd.f32 %v1497_v6, %v1444_v63  ;;  %v1538_v9 = vpop.f32.mrb[57].mxu1  ;;  %v1499_v10 = vpop.f32.mrb[58].mxu0 }
 0x349   : > { %v1543_v11 = vmax.f32 %v1496_v4, 0.0  ;;  %v1539_v12 = vadd.f32 %v1538_v9, %v1444_v63  ;;  %v1540_v13 = vpop.f32.mrb[58].mxu1  ;;  %v1500_v14 = vpop.f32.mrb[59].mxu0 }
 0x34a   : > { %v1545_v15 = vmax.f32 %v1537_v7, 0.0  ;;  %v1544_v16 = vmax.f32 %v1498_v8, 0.0  ;;  %v1541_v17 = vpop.f32.mrb[59].mxu1 }
 0x34b   : > { %v1562_v18 = vsel %vm1558_vm3, %v1543_v11, 0.0  ;;  %v1570_v0 = vsel %vm1558_vm3, %v1543_v11, -inf  ;;  %v1546_v19 = vmax.f32 %v1539_v12, 0.0 }
 0x34c   : > { %1566 = vst [vmem:[%s367_s11] sm:$0x1f] %v1562_v18  ;;  %v1575_v20 = vsel %vm1574_vm5, %v1570_v0, -inf  ;;  %v1572_v21 = vsel %vm1560_vm4, %v1545_v15, -inf  ;;  %v1563_v22 = vsel %vm1559_vm6, %v1544_v16, 0.0  ;;  %v1564_v23 = vsel %vm1560_vm4, %v1545_v15, 0.0 }
 0x34d   : > { %v1577_v24 = vsel %vm1574_vm5, %v1572_v21, -inf  ;;  %1567 = vst [vmem:[%s367_s11 + $0x8] sm:$0x1f] %v1563_v22  ;;  %v1571_v25 = vsel %vm1559_vm6, %v1544_v16, -inf  ;;  %v1573_v26 = vsel %vm1561_vm7, %v1546_v19, -inf  ;;  %v1565_v28 = vsel %vm1561_vm7, %v1546_v19, 0.0 }
 0x34e   : > { %v1576_v27 = vsel %vm1574_vm5, %v1571_v25, -inf  ;;  %1568 = vst [vmem:[%s367_s11 + $0x10] sm:$0x1f] %v1564_v23  ;;  %v1578_v29 = vsel %vm1574_vm5, %v1573_v26, -inf  ;;  %1569 = vst [vmem:[%s367_s11 + $0x18] sm:$0x1f] %v1565_v28 }
 0x34f   : > { %v1579_v30 = vmax.f32 %v1575_v20, %v1576_v27  ;;  %v1580_v31 = vmax.f32 %v1577_v24, %v1578_v29 }
 0x351   : > { %v1581_v32 = vmax.f32 %v1579_v30, %v1580_v31 }
 0x353   : > { %1582 = vmax.xlane.f32.xlu1 %v1581_v32 }
 0x3e0   : > { %v1583_v33 = vpop.xlane.xlu1 %1582 }
 0x3e1   : > { %v1584_v34 = vsub.f32 %v1562_v18, %v1583_v33  ;;  %v1585_v35 = vsub.f32 %v1563_v22, %v1583_v33  ;;  %v1586_v36 = vsub.f32 %v1564_v23, %v1583_v33  ;;  %v1587_v37 = vsub.f32 %v1565_v28, %v1583_v33  ;;  %1610 = vst.msk [vmem:[%s372_s15] sm:$0x1f] %vm1609_vm8, %v1583_v33 }
 0x3e3   : > { %v1588_v38 = vmul.f32 1.442695, %v1584_v34  ;;  %v1590_v39 = vmul.f32 1.442695, %v1585_v35  ;;  %v1592_v40 = vmul.f32 1.442695, %v1586_v36 }
 0x3e4   : > { %v1594_v41 = vmul.f32 1.442695, %v1587_v37 }
 0x3e5   : > { %1893 = vpow2.f32 %v1588_v38 }
 0x3e6   : > { %1895 = vpow2.f32 %v1590_v39 }
 0x3e7   : > { %1897 = vpow2.f32 %v1592_v40 }
 0x3e8   : > { %1899 = vpow2.f32 %v1594_v41 }
 0x3ef   : > { %v1894_v42 = vpop.eup %1893 }
 0x3f0   : > { %v1896_v43 = vpop.eup %1895  ;;  %v1596_v44 = vsel %vm1558_vm3, %v1894_v42, 0.0 }
 0x3f1   : > { %v1898_v45 = vpop.eup %1897  ;;  %v1597_v46 = vsel %vm1559_vm6, %v1896_v43, 0.0  ;;  %v1600_v47 = vsel %vm1574_vm5, %v1596_v44, 0.0 }
 0x3f2   : > { %v1900_v48 = vpop.eup %1899  ;;  %v1598_v49 = vsel %vm1560_vm4, %v1898_v45, 0.0  ;;  %v1601_v50 = vsel %vm1574_vm5, %v1597_v46, 0.0 }
 0x3f3   : > { %v1599_v51 = vsel %vm1561_vm7, %v1900_v48, 0.0  ;;  %v1602_v52 = vadd.f32 %v1601_v50, %v1600_v47  ;;  %v1603_v53 = vsel %vm1574_vm5, %v1598_v49, 0.0 }
 0x3f4   : > { %v1605_v55 = vsel %vm1574_vm5, %v1599_v51, 0.0 }
 0x3f5   : > { %v1604_v54 = vadd.f32 %v1603_v53, %v1602_v52 }
 0x3f7   : > { %v1606_v56 = vadd.f32 %v1605_v55, %v1604_v54 }
 0x3f9   : > { %1607 = vadd.xlane.f32.xlu0 %v1606_v56 }
 0x486   : > { %v1608_v57 = vpop.xlane.xlu0 %1607 }
 0x487   : > { %1611 = vst.msk [vmem:[%s376_s18] sm:$0x1f] %vm1609_vm8, %v1608_v57 }
 0x488 PF: > { %s20_s30 = sadd.s32 1, %s1907_s30  }
 0x489   : > { %p17_p6 = scmp.ge.s32.totalorder %s20_s30, 4  }
 0x48b   :  { %19 = sbr.rel (!%p17_p6) target bundleno = 1 (0x1), region = 102 }

</bundles_post_ra>
